<compile_context>
chip_gen: v7x
topology: tpu7x:2x2x1
jax: 0.10.0
libtpu: 0.0.40
codegen_flags: <defaults>
</compile_context>

<pallas_src>
import functools

import jax
import jax.numpy as jnp
from jax.experimental import pallas as pl
from jax.experimental.pallas import tpu as pltpu


# ----------------------------- kernel body ---------------------------------


def _autoencoder_kernel(x_ref, wgt_ref, bg_ref, wht_ref, bh_ref, out_ref):
    # x_ref:   (TB, Q)  f32   input user-vector tile (cast to bf16 in-kernel)
    # wgt_ref: (Q, Kp)  bf16  g.weight^T, K zero-padded to Kp (VMEM resident)
    # bg_ref:  (1, Kp)  f32   g.bias, zero-padded
    # wht_ref: (Kp, Q)  bf16  h.weight^T, padded rows are zero (VMEM resident)
    # bh_ref:  (1, Q)   f32   h.bias
    # out_ref: (TB, Q)  bf16/f32  reconstructed user-vector tile
    x = x_ref[...].astype(jnp.bfloat16)           # cast under the DMA, VPU-free

    # hidden = sigmoid(x @ g.weight^T + g.bias)  -> (TB, Kp), f32 accumulate.
    z1 = jnp.dot(x, wgt_ref[...], preferred_element_type=jnp.float32)
    z1 = z1 + bg_ref[...]
    hid = 1.0 / (1.0 + jnp.exp(-z1))              # exact sigmoid (EUP exp)

    # out = sigmoid(hidden @ h.weight^T + h.bias) -> (TB, Q).
    # Padded hid columns are sigmoid(0)=0.5 but multiply zero rows of wht -> exact.
    z2 = jnp.dot(hid.astype(jnp.bfloat16), wht_ref[...],
                 preferred_element_type=jnp.float32)
    z2 = z2 + bh_ref[...]
    out_ref[...] = (1.0 / (1.0 + jnp.exp(-z2))).astype(out_ref.dtype)


# ----------------------------- helpers --------------------------------------


def _cdiv(a, b):
    return -(-a // b)


def _round_up(n, m):
    return _cdiv(n, m) * m


@functools.lru_cache(maxsize=1)
def _vmem_capacity_bytes():
    # One-time hardware query; conservative v7x per-core fallback.
    try:
        return int(pltpu.get_tpu_info().vmem_capacity_bytes)
    except Exception:  # pragma: no cover - query unsupported in this build
        return 64 << 20


def _vmem_estimate(tb, q, kp, x_itemsize, out_itemsize):
    params = 2 * q * kp * 2 + (kp + q) * 4                 # bf16 weights + f32 biases
    params *= 2                                            # default double-buffering
    acts = 2 * tb * q * x_itemsize + 2 * tb * q * out_itemsize  # 2x-buffered x / out
    interm = tb * (2 * q + 2 * kp) * 4 + tb * (q + kp) * 2      # z1/z2/hid f32 + bf16 copies
    return params + acts + interm


def _choose_tile(batch, q, kp, x_itemsize, out_itemsize, tb_max, vmem_cap):
    # >=2 grid steps whenever the batch allows it, so dimension_semantics
    # ("parallel",) can shard the batch across v7x's two TensorCores.
    n_min = 2 if batch > 16 else 1
    n_steps = max(n_min, _cdiv(batch, tb_max))
    tb = _round_up(max(16, _cdiv(batch, n_steps)), 16)     # bf16 packs 16 rows/vreg
    tb = min(tb, _round_up(batch, 16))
    # Shrink if the tile would blow the per-generation VMEM budget.
    while tb > 16 and _vmem_estimate(tb, q, kp, x_itemsize, out_itemsize) > 0.6 * vmem_cap:
        tb = max(16, _round_up(tb // 2, 16))
    return tb


@functools.lru_cache(maxsize=None)
def _build_call(bp, tb, q, kp, x_dtype, out_dtype, vmem_limit):
    return pl.pallas_call(
        _autoencoder_kernel,
        out_shape=jax.ShapeDtypeStruct((bp, q), out_dtype),
        grid_spec=pltpu.PrefetchScalarGridSpec(
            num_scalar_prefetch=0,
            grid=(bp // tb,),
            in_specs=[
                pl.BlockSpec((tb, q), lambda i: (i, 0)),    # x tile (pipelined)
                pl.BlockSpec((q, kp), lambda i: (0, 0)),    # g.weight^T (resident)
                pl.BlockSpec((1, kp), lambda i: (0, 0)),    # g.bias
                pl.BlockSpec((kp, q), lambda i: (0, 0)),    # h.weight^T (resident)
                pl.BlockSpec((1, q), lambda i: (0, 0)),     # h.bias
            ],
            out_specs=pl.BlockSpec((tb, q), lambda i: (i, 0)),
        ),
        compiler_params=pltpu.CompilerParams(
            dimension_semantics=("parallel",),              # batch axis -> megacore
            vmem_limit_bytes=vmem_limit,
        ),
    )


# ----------------------------- public API -----------------------------------


def prepare_autoencoder_params(g_weight, g_bias, h_weight, h_bias):
    """One-time (off the hot path) parameter prep.

    g_weight: (K, Q) f32  nn.Linear(num_question, k).weight   (PyTorch [out,in])
    g_bias:   (K,)   f32
    h_weight: (Q, K) f32  nn.Linear(k, num_question).weight
    h_bias:   (Q,)   f32

    Returns (wgt, bg, wht, bh):
      wgt (Q, Kp) bf16, bg (1, Kp) f32, wht (Kp, Q) bf16, bh (1, Q) f32,
      with K zero-padded to Kp = round_up(K, 128) (numerically exact) and the
      weights pre-transposed to [in, out] layout for plain A @ B in the kernel.
    """
    K, Q = g_weight.shape
    assert h_weight.shape == (Q, K)
    Kp = _round_up(K, 128)

    wg = jnp.pad(g_weight.astype(jnp.float32), ((0, Kp - K), (0, 0)))   # (Kp, Q)
    bg = jnp.pad(g_bias.astype(jnp.float32), (0, Kp - K)).reshape(1, Kp)
    wh = jnp.pad(h_weight.astype(jnp.float32), ((0, 0), (0, Kp - K)))   # (Q, Kp)
    bh = h_bias.astype(jnp.float32).reshape(1, Q)

    wgt = wg.T.astype(jnp.bfloat16)    # (Q, Kp)
    wht = wh.T.astype(jnp.bfloat16)    # (Kp, Q)  padded rows are exactly zero
    return wgt, bg, wht, bh


def autoencoder_forward(x, params, *, tb_max=1024, out_dtype=jnp.bfloat16):
    """Forward pass.  x: (B, Q) f32 user vectors; params from prepare_autoencoder_params.

    Returns (B, Q) in `out_dtype` (bf16 by default for HBM-traffic reasons;
    pass out_dtype=jnp.float32 for a bit-closer match to the PyTorch module).
    """
    wgt, bg, wht, bh = params
    B, Q = x.shape
    Kp = wgt.shape[1]
    assert wgt.shape == (Q, Kp) and wht.shape == (Kp, Q)
    out_dtype = jnp.dtype(out_dtype)

    vmem_cap = _vmem_capacity_bytes()
    tb = _choose_tile(B, Q, Kp, jnp.dtype(x.dtype).itemsize, out_dtype.itemsize,
                      tb_max, vmem_cap)
    n_steps = _cdiv(B, tb)
    Bp = n_steps * tb

    # Minimal, conditional ragged-batch padding (few rows by construction).
    xx = x if Bp == B else jnp.pad(x, ((0, Bp - B), (0, 0)))

    est = _vmem_estimate(tb, Q, Kp, jnp.dtype(x.dtype).itemsize, out_dtype.itemsize)
    vmem_limit = int(min(0.75 * vmem_cap, max(32 << 20, 2 * est)))

    call = _build_call(Bp, tb, Q, Kp, jnp.dtype(x.dtype), out_dtype, vmem_limit)
    out = call(xx, wgt, bg, wht, bh)
    return out if Bp == B else out[:B]


def autoencoder_forward_raw(x, g_weight, g_bias, h_weight, h_bias, **kwargs):
    """Convenience wrapper matching the nn.Module signature (preps params per call;
    in a training/eval loop call prepare_autoencoder_params once and reuse)."""
    return autoencoder_forward(
        x, prepare_autoencoder_params(g_weight, g_bias, h_weight, h_bias), **kwargs)


def _reference_forward(x, g_weight, g_bias, h_weight, h_bias):
    hid = jax.nn.sigmoid(x @ g_weight.T + g_bias)
    return jax.nn.sigmoid(hid @ h_weight.T + h_bias)


if __name__ == "__main__":
    # Small shapes implied by the module: num_question=Q, hidden k=K (default 100).
    # B=200 exercises the ragged-batch path (2 grid steps, 24 padded rows) and
    # K=100 exercises the exact zero-pad of the hidden dim up to 128.
    B, Q, K = 200, 384, 100

    key = jax.random.PRNGKey(0)
    kx, kgw, kgb, khw, khb = jax.random.split(key, 5)

    # Deterministic init mimicking nn.Linear default (uniform +-1/sqrt(fan_in)).
    g_bound = 1.0 / (Q ** 0.5)
    h_bound = 1.0 / (K ** 0.5)
    g_weight = jax.random.uniform(kgw, (K, Q), jnp.float32, -g_bound, g_bound)
    g_bias = jax.random.uniform(kgb, (K,), jnp.float32, -g_bound, g_bound)
    h_weight = jax.random.uniform(khw, (Q, K), jnp.float32, -h_bound, h_bound)
    h_bias = jax.random.uniform(khb, (Q,), jnp.float32, -h_bound, h_bound)

    # Input user vectors (e.g. imputed sparse ratings in [0, 1]).
    x = jax.random.uniform(kx, (B, Q), jnp.float32, 0.0, 1.0)

    # One-time parameter prep (bf16 cast + K padding + pre-transpose), then forward.
    params = prepare_autoencoder_params(g_weight, g_bias, h_weight, h_bias)
    out = autoencoder_forward(x, params)                    # bf16 output by default
    out = jax.block_until_ready(out)

    ref = _reference_forward(x, g_weight, g_bias, h_weight, h_bias)
    assert out.shape == (B, Q)
    max_err = float(jnp.max(jnp.abs(out.astype(jnp.float32) - ref)))
    # bf16 matmul operands + bf16 output => relaxed tolerance vs f32 reference.
    assert max_err < 2e-2, f"mismatch vs reference: max abs err {max_err}"

    print("KERNEL_OK")
</pallas_src>

<mosaic_0001>
module attributes {stable_mosaic.version = 11 : i64} {
  func.func @_autoencoder_kernel(%arg0: i32, %arg1: memref<112x384xf32, #tpu.memory_space<vmem>>, %arg2: memref<384x128xbf16, #tpu.memory_space<vmem>>, %arg3: memref<1x128xf32, #tpu.memory_space<vmem>>, %arg4: memref<128x384xbf16, #tpu.memory_space<vmem>>, %arg5: memref<1x384xf32, #tpu.memory_space<vmem>>, %arg6: memref<112x384xbf16, #tpu.memory_space<vmem>>) attributes {dimension_semantics = [#tpu.dimension_semantics<parallel>], iteration_bounds = array<i64: 2>, scalar_prefetch = 0 : i64, scratch_operands = 0 : i64, tpu.core_type = #tpu.core_type<tc>, window_params = [{transform_indices = @transform_0, window_bounds = array<i64: 112, 384>}, {pipeline_mode = #tpu.pipeline_mode<synchronous>, transform_indices = @transform_1, window_bounds = array<i64: 384, 128>}, {pipeline_mode = #tpu.pipeline_mode<synchronous>, transform_indices = @transform_2, window_bounds = array<i64: 1, 128>}, {pipeline_mode = #tpu.pipeline_mode<synchronous>, transform_indices = @transform_3, window_bounds = array<i64: 128, 384>}, {pipeline_mode = #tpu.pipeline_mode<synchronous>, transform_indices = @transform_4, window_bounds = array<i64: 1, 384>}, {transform_indices = @transform_5, window_bounds = array<i64: 112, 384>}]} {
    %c0 = arith.constant 0 : index
    %c0_0 = arith.constant 0 : index
    %0 = vector.load %arg1[%c0, %c0_0] : memref<112x384xf32, #tpu.memory_space<vmem>>, vector<112x384xf32>
    %1 = arith.truncf %0 : vector<112x384xf32> to vector<112x384xbf16>
    %c0_1 = arith.constant 0 : index
    %c0_2 = arith.constant 0 : index
    %2 = vector.load %arg2[%c0_1, %c0_2] : memref<384x128xbf16, #tpu.memory_space<vmem>>, vector<384x128xbf16>
    %cst = arith.constant dense<0.000000e+00> : vector<112x128xf32>
    %3 = tpu.matmul %1, %2, %cst {dimension_numbers = #tpu.dot_dimension_numbers<[1], [0], [0], [1], [0, 0, 1, 1], [], []>} : vector<112x384xbf16>, vector<384x128xbf16>, vector<112x128xf32> -> vector<112x128xf32>
    %c0_3 = arith.constant 0 : index
    %c0_4 = arith.constant 0 : index
    %4 = vector.load %arg3[%c0_3, %c0_4] : memref<1x128xf32, #tpu.memory_space<vmem>>, vector<1x128xf32>
    %5 = vector.broadcast %4 : vector<1x128xf32> to vector<112x128xf32>
    %6 = arith.addf %3, %5 : vector<112x128xf32>
    %cst_5 = arith.constant 0.000000e+00 : f32
    %7 = vector.broadcast %cst_5 : f32 to vector<112x128xf32>
    %8 = arith.subf %7, %6 : vector<112x128xf32>
    %9 = math.exp %8 : vector<112x128xf32>
    %cst_6 = arith.constant 1.000000e+00 : f32
    %10 = vector.broadcast %cst_6 : f32 to vector<112x128xf32>
    %11 = arith.addf %10, %9 : vector<112x128xf32>
    %cst_7 = arith.constant 1.000000e+00 : f32
    %12 = vector.broadcast %cst_7 : f32 to vector<112x128xf32>
    %13 = arith.divf %12, %11 : vector<112x128xf32>
    %14 = arith.truncf %13 : vector<112x128xf32> to vector<112x128xbf16>
    %c0_8 = arith.constant 0 : index
    %c0_9 = arith.constant 0 : index
    %15 = vector.load %arg4[%c0_8, %c0_9] : memref<128x384xbf16, #tpu.memory_space<vmem>>, vector<128x384xbf16>
    %cst_10 = arith.constant dense<0.000000e+00> : vector<112x384xf32>
    %16 = tpu.matmul %14, %15, %cst_10 {dimension_numbers = #tpu.dot_dimension_numbers<[1], [0], [0], [1], [0, 0, 1, 1], [], []>} : vector<112x128xbf16>, vector<128x384xbf16>, vector<112x384xf32> -> vector<112x384xf32>
    %c0_11 = arith.constant 0 : index
    %c0_12 = arith.constant 0 : index
    %17 = vector.load %arg5[%c0_11, %c0_12] : memref<1x384xf32, #tpu.memory_space<vmem>>, vector<1x384xf32>
    %18 = vector.broadcast %17 : vector<1x384xf32> to vector<112x384xf32>
    %19 = arith.addf %16, %18 : vector<112x384xf32>
    %cst_13 = arith.constant 0.000000e+00 : f32
    %20 = vector.broadcast %cst_13 : f32 to vector<112x384xf32>
    %21 = arith.subf %20, %19 : vector<112x384xf32>
    %22 = math.exp %21 : vector<112x384xf32>
    %cst_14 = arith.constant 1.000000e+00 : f32
    %23 = vector.broadcast %cst_14 : f32 to vector<112x384xf32>
    %24 = arith.addf %23, %22 : vector<112x384xf32>
    %cst_15 = arith.constant 1.000000e+00 : f32
    %25 = vector.broadcast %cst_15 : f32 to vector<112x384xf32>
    %26 = arith.divf %25, %24 : vector<112x384xf32>
    %27 = arith.truncf %26 : vector<112x384xf32> to vector<112x384xbf16>
    %c0_16 = arith.constant 0 : index
    %c0_17 = arith.constant 0 : index
    %28 = vector.load %arg6[%c0_16, %c0_17] : memref<112x384xbf16, #tpu.memory_space<vmem>>, vector<112x384xbf16>
    tpu.vector_store %arg6[%c0_16, %c0_17], %27 {strides = array<i32>} : memref<112x384xbf16, #tpu.memory_space<vmem>>, vector<112x384xbf16>,
    return
  }
  func.func @transform_0(%arg0: i32) -> (i32, i32) {
    %c0_i32 = arith.constant 0 : i32
    %c0_i32_0 = arith.constant 0 : i32
    return %arg0, %c0_i32 : i32, i32
  }
  func.func @transform_1(%arg0: i32) -> (i32, i32) {
    %c0_i32 = arith.constant 0 : i32
    %c0_i32_0 = arith.constant 0 : i32
    %c0_i32_1 = arith.constant 0 : i32
    return %c0_i32, %c0_i32_0 : i32, i32
  }
  func.func @transform_2(%arg0: i32) -> (i32, i32) {
    %c0_i32 = arith.constant 0 : i32
    %c0_i32_0 = arith.constant 0 : i32
    %c0_i32_1 = arith.constant 0 : i32
    return %c0_i32, %c0_i32_0 : i32, i32
  }
  func.func @transform_3(%arg0: i32) -> (i32, i32) {
    %c0_i32 = arith.constant 0 : i32
    %c0_i32_0 = arith.constant 0 : i32
    %c0_i32_1 = arith.constant 0 : i32
    return %c0_i32, %c0_i32_0 : i32, i32
  }
  func.func @transform_4(%arg0: i32) -> (i32, i32) {
    %c0_i32 = arith.constant 0 : i32
    %c0_i32_0 = arith.constant 0 : i32
    %c0_i32_1 = arith.constant 0 : i32
    return %c0_i32, %c0_i32_0 : i32, i32
  }
  func.func @transform_5(%arg0: i32) -> (i32, i32) {
    %c0_i32 = arith.constant 0 : i32
    %c0_i32_0 = arith.constant 0 : i32
    return %arg0, %c0_i32 : i32, i32
  }
}

</mosaic_0001>

<bundles_post_ra>
// kernel: tpu_custom_call.1
= control target key start
LH: loop header
LB: loop body
LE: loop exit
PB: predicated region body
PF: predicated region fallthrough
CT: control target
= control target key end

     0   :  { %10 = vsyncpa [#allocation3], 0  ;;  %s3033_s0 = inlined_call_operand.hbm [shape: f32[224,384], index: 0, kind: input, shape index: {}]   ;;  %s3034_s1 = inlined_call_operand.hbm [shape: bf16[384,128], index: 1, kind: input, shape index: {}]   ;;  %s3035_s2 = inlined_call_operand.vmem [shape: f32[1,128], index: 2, kind: input, shape index: {}]   ;;  %s3036_s3 = inlined_call_operand.hbm [shape: bf16[128,384], index: 3, kind: input, shape index: {}]   ;;  %s3037_s4 = inlined_call_operand.vmem [shape: f32[1,384], index: 4, kind: input, shape index: {}]   ;;  %s3038_s5 = inlined_call_operand.hbm [shape: bf16[224,384], index: 5, kind: output, shape index: {}]  }
   0x1   :  { %12 = vsyncpa [#allocation3 + $0x1], 0 }
   0x2   :  { %13 = vsyncpa [#allocation6], 0 }
   0x3   :  { %14 = vsyncpa [#allocation4], 0 }
   0x4   :  { %16 = vsyncpa [#allocation4 + $0x1], 0  ;;  %s2564_s18 = smov 0   ;;  %s2566_s19 = smov 0  }
   0x5   :  { %s2568_s20 = smov 0   ;;  %s2570_s21 = smov 0  }
   0x6 LB: > { %s2585_s22 = sadd.s32 4294967295, %s2517_s21   ;;  %s1703_s23 = sadd.s32 4294967294, %s2517_s21   ;;  %s2517_s21 = sphi %s2570_s21, %s3058_s21   ;;  %s2513_s20 = sphi %s2568_s20, %s3057_s20   ;;  %s2509_s19 = sphi %s2566_s19, %s3056_s19   ;;  %s2505_s18 = sphi %s2564_s18, %s3055_s18  }
   0x7   : > { %p42_p0 = scmp.ne.s32.totalorder %s2509_s19, %s2505_s18  ;;  %p3039_p1 = scmp.eq.s32.totalorder %s2585_s22, 0 }
   0x8   : > { %p156_p3 = scmp.eq.s32.totalorder %s1703_s23, 1  ;;  %p1704_p5 = scmp.ge.s32.totalorder %s2517_s21, 1 }
   0x9   : > { %p2594_p4 = por %p3039_p1, %p42_p0  ;;  %p163_p7 = scmp.lt.s32.totalorder %s2517_s21, 3 }
   0xa   : > { %p2599_p6 = por %p156_p3, %p42_p0  ;;  %s2519_s27 = smov [#allocation5]  }
   0xb   : > { %s3042_s24 = scalar_select %p2594_p4, 1, 0 }
   0xc   : > { %s3043_s25 = scalar_select %p2599_p6, 1, 0 }
   0xd   : > { %p2604_p8 = pnand %p1704_p5, %p163_p7  ;;  %s175_s28 = sshll.u32 %s2519_s27, 4  ;;  %s2608_s28 = int_to_ptr.vmem [resolvable:$true] %s175_s28 }
   0xe   : > { %s2520_s30 = smov [#allocation7]   ;;  %s2361_s9 = scalar_lea.hbm %s3034_s1, 3072 }
   0xf   : > { %p2013_p9 = pneg %p2604_p8  ;;  %s191_s6 = sshll.u32 %s2520_s30, 4  ;;  %s2619_s6 = int_to_ptr.vmem [resolvable:$true] %s191_s6 }
  0x10   : > { %p2362_p12 = scmp.ne.s32.totalorder %s3034_s1, %s2361_s9  ;;  %p2368_p5 = scmp.lt.u32.totalorder %s2361_s9, %s3034_s1 }
  0x11   : > { %p2615_p11 = pnand %p2013_p9, %p3039_p1 }
  0x13   : > { %p2363_p13 = pneg %p2615_p11 }
  0x15   : > { %p2364_p0 = pnand %p2363_p13, %p2362_p12 }
  0x17   : > { %p2365_p3 = pneg %p2364_p0 }
  0x19   : > { %p2370_p7 = pnand %p2368_p5, %p2365_p3 }
  0x1b   : > { %2373 = shalt.err (!%p2370_p7)
}
  0x1c   : > { %s2374_s14 = scalar_lea.vmem %s2608_s28, 3072  ;;  %p2382_p2 = scmp.lt.s32.totalorder %s2608_s28, %s2608_s28 }
  0x1d   : > { %p2375_p9 = scmp.ne.s32.totalorder %s2608_s28, %s2374_s14  ;;  %p2383_p12 = scmp.lt.s32.totalorder %s2374_s14, %s2374_s14 }
  0x1f   : > { %p2377_p10 = pnand %p2375_p9, %p2363_p13  ;;  %p2384_p0 = por %p2383_p12, %p2382_p2 }
  0x21   : > { %p2378_p1 = pneg %p2377_p10 }
  0x23   : > { %p2385_p6 = pnand %p2384_p0, %p2378_p1 }
  0x25   : > { %2388 = shalt.err (!%p2385_p6)
}
  0x26   : > { %s2521_s15 = smov 64   ;;  %s2522_s16 = smov 4  }
  0x27   : > { %2016 = dma.hbm_to_vmem [thread:$0]  (!%p2615_p11), %s3034_s1, 3072, %s2608_s28, [#allocation6], %s2521_s15, %s2521_s15, %s2522_s16  }
  0x28   : > { %s2389_s7 = scalar_lea.hbm %s3036_s3, 3072 }
  0x29   : > { %p2390_p2 = scmp.ne.s32.totalorder %s3036_s3, %s2389_s7  ;;  %p2396_p10 = scmp.lt.u32.totalorder %s2389_s7, %s3036_s3 }
  0x2b   : > { %p2392_p1 = pnand %p2390_p2, %p2363_p13 }
  0x2d   : > { %p2393_p6 = pneg %p2392_p1 }
  0x2f   : > { %p2398_p3 = pnand %p2396_p10, %p2393_p6 }
  0x31   : > { %2401 = shalt.err (!%p2398_p3)
}
  0x32   : > { %s2402_s28 = scalar_lea.vmem %s2619_s6, 3072  ;;  %p2410_p12 = scmp.lt.s32.totalorder %s2619_s6, %s2619_s6 }
  0x33   : > { %p2403_p5 = scmp.ne.s32.totalorder %s2619_s6, %s2402_s28  ;;  %p2411_p0 = scmp.lt.s32.totalorder %s2402_s28, %s2402_s28 }
  0x35   : > { %p2405_p7 = pnand %p2403_p5, %p2363_p13  ;;  %p2412_p2 = por %p2411_p0, %p2410_p12 }
  0x37   : > { %p2406_p9 = pneg %p2405_p7 }
  0x39   : > { %p2413_p1 = pnand %p2412_p2, %p2406_p9 }
  0x3b   : > { %2416 = shalt.err (!%p2413_p1)
}
  0x3c   : > { %s2523_s12 = smov 192   ;;  %s2524_s13 = smov 12  }
  0x3d   : > { %2019 = dma.hbm_to_vmem [thread:$0]  (!%p2615_p11), %s3036_s3, 3072, %s2619_s6, [#allocation6], %s2523_s12, %s2523_s12, %s2524_s13  }
  0x3e   : > { %s2674_s16 = sadd.s32 1, %s2517_s21   ;;  %s29_s23 = sadd.s32 1, %s2513_s20 }
  0x3f   : > { %s26_s17 = ssub.s32 %s2517_s21, %s2674_s16  ;;  %p36_p6 = scmp.ne.s32.totalorder %s2513_s20, %s2509_s19 }
  0x40   : > { %p27_p13 = scmp.eq.s32.totalorder %s26_s17, 0  ;;  %p37_p10 = scmp.eq.s32.totalorder %s2517_s21, 0 }
  0x41   : > { %p2030_p3 = scmp.lt.s32.totalorder %s2517_s21, 2  ;;  %p3046_p7 = scmp.eq.s32.totalorder %s2585_s22, 1 }
  0x42   : > { %s2684_s27 = scalar_select %p27_p13, %s2513_s20, %s29_s23  }
  0x43   : > { %p38_p5 = por %p37_p10, %p36_p6  ;;  %p2688_p9 = por %p3046_p7, %p36_p6 }
  0x44   : > { %s208_s29 = sand.u32 1, %s2513_s20   ;;  %s2031_s7 = smul.u32 5376, %s2517_s21 }
  0x45   : > { %s3047_s30 = scalar_select %p2688_p9, 1, 0 }
  0x46   : > { %s1996_s6 = smul.u32 336, %s208_s29  ;;  %s2697_s10 = scalar_lea.hbm %s3033_s0, %s2031_s7 }
  0x47   : > { %p2699_p11 = pnand %p2030_p3, %p38_p5  ;;  %s2705_s13 = scalar_lea.sflag [#allocation3], %s208_s29 }
  0x48   : > { %s212_s28 = scalar_lea.vmem [#allocation2], %s1996_s6  ;;  %s2417_s14 = scalar_lea.hbm %s2697_s10, 5376 }
  0x49   : > { %s220_s12 = sshll.u32 %s212_s28, 4  ;;  %p2418_p12 = scmp.ne.s32.totalorder %s2697_s10, %s2417_s14  ;;  %s2703_s12 = int_to_ptr.vmem [resolvable:$true] %s220_s12 }
  0x4a   : > { %p2419_p0 = pneg %p2699_p11  ;;  %s2422_s23 = scalar_lea.hbm %s3033_s0, 10752 }
  0x4b   : > { %p2423_p13 = scmp.lt.u32.totalorder %s2697_s10, %s3033_s0  ;;  %p2424_p6 = scmp.lt.u32.totalorder %s2422_s23, %s2417_s14 }
  0x4c   : > { %p2420_p2 = pnand %p2419_p0, %p2418_p12  ;;  %p2426_p3 = scmp.lt.u32.totalorder %s2417_s14, %s2697_s10 }
  0x4d   : > { %p2425_p10 = por %p2424_p6, %p2423_p13 }
  0x4e   : > { %p2421_p1 = pneg %p2420_p2 }
  0x4f   : > { %p2427_p5 = por %p2426_p3, %p2425_p10 }
  0x51   : > { %p2428_p7 = pnand %p2427_p5, %p2421_p1 }
  0x53   : > { %2431 = shalt.err (!%p2428_p7)
}
  0x54   : > { %s2432_s29 = scalar_lea.vmem %s2703_s12, 5376  ;;  %s2525_s6 = smov [#allocation2]  }
  0x55   : > { %p2433_p12 = scmp.ne.s32.totalorder %s2703_s12, %s2432_s29  ;;  %s2437_s9 = sshll.u32 %s2525_s6, 4  ;;  %s2438_s9 = int_to_ptr.vmem [resolvable:$false] %s2437_s9 }
  0x56   : > { %s2439_s28 = scalar_lea.vmem %s2438_s9, 10752  ;;  %p2440_p4 = scmp.lt.s32.totalorder %s2703_s12, %s2438_s9 }
  0x57   : > { %p2435_p2 = pnand %p2433_p12, %p2419_p0  ;;  %p2441_p13 = scmp.lt.s32.totalorder %s2439_s28, %s2432_s29 }
  0x59   : > { %p2436_p9 = pneg %p2435_p2  ;;  %p2442_p6 = por %p2441_p13, %p2440_p4 }
  0x5b   : > { %p2443_p10 = pnand %p2442_p6, %p2436_p9 }
  0x5d   : > { %2446 = shalt.err (!%p2443_p10)
}
  0x5e   : > { %s2526_s14 = smov 384   ;;  %s2527_s15 = smov 24  }
  0x5f   : > { %2023 = dma.hbm_to_vmem [thread:$0]  (!%p2699_p11), %s2697_s10, 5376, %s2703_s12, %s2705_s13, %s2526_s14, %s2526_s14, %s2527_s15  }
  0x60   : > { %232 = sbr.rel (%p2604_p8) target bundleno = 733 (0x2dd), region = 40  ;;  %s2736_s17 = sand.u32 (!%p2604_p8), 1, %s2509_s19  }
  0x61   : > { %s1998_s23 = smul.u32 (!%p2604_p8), 336, %s2736_s17  ;;  %s235_s7 = scalar_lea.sflag (!%p2604_p8), [#allocation3], %s2736_s17 }
  0x62   : > { %p3049_p4 = scmp.ne.s32.totalorder (!%p2604_p8), %s3042_s24, 0 }
  0x63   : > { %s2740_s8 = scalar_lea.vmem (!%p2604_p8), [#allocation2], %s1998_s23 }
  0x67   : > { %2492 = dma.done.wait (%p3049_p4), %s235_s7, 5376  }
  0x68   : > { %2494 = vsyncadd (%p3049_p4), %s235_s7, 4294961920  ;;  %p3050_p9 = scmp.eq.s32.totalorder %s2585_s22, 0 }
  0x6a   : > { %2496 = dma.done.wait (%p3050_p9), [#allocation6], 6144   ;;  %p3051_p8 = pmov %p3050_p9 }
  0x6b   : > { %v2528_v0 = vmov 0.0   ;;  %vm2529_vm0 = vmmov 0   ;;  %v2081_v1 = vld [vmem:[#allocation5 + $0x40] sm:$0xff]   ;;  %v2084_v4 = vld [vmem:[#allocation5 + $0x48] sm:$0xff]   ;;  %v2087_v7 = vld [vmem:[#allocation5 + $0x50] sm:$0xff]   ;;  %s1999_s12 = smul.u32 168, %s2736_s17 }
  0x6c   : > { %2498 = vsyncadd (%p3051_p8), [#allocation6], 4294961152  ;;  %1908 = vmatprep.subr.bf16.mxu1 %v2528_v0  ;;  %1924 = vmatprep.mubr.msk.bf16.mxu1 %vm2529_vm0, %v2528_v0  ;;  %v2082_v2 = vld [vmem:[#allocation5] sm:$0xff]   ;;  %v2085_v5 = vld [vmem:[#allocation5 + $0x8] sm:$0xff]   ;;  %s2034_s29 = smul.u32 2688, %s2585_s22  ;;  %s1597_s15 = scalar_lea.sflag [#allocation4], %s2736_s17 }
  0x6d   : > { %1820 = vmatprep.subr.bf16.mxu0 %v2081_v1  ;;  %v2083_v3 = vld [vmem:[#allocation5 + $0x80] sm:$0xff]   ;;  %v2086_v6 = vld [vmem:[#allocation5 + $0x88] sm:$0xff]   ;;  %v2088_v8 = vld [vmem:[#allocation5 + $0x10] sm:$0xff]   ;;  %s2898_s13 = scalar_lea.vmem [#allocation8], %s1999_s12  ;;  %p3052_p0 = scmp.ne.s32.totalorder %s3047_s30, 0 }
  0x6e   : > { %1821 = vmatpush3.bf16.msra.mxu0 %v2082_v2  ;;  %1909 = vmatpush3.bf16.msra.mxu1 %v2083_v3  ;;  %v2089_v9 = vld [vmem:[#allocation5 + $0x90] sm:$0xff]   ;;  %v2090_v10 = vld [vmem:[#allocation5 + $0x58] sm:$0xff]   ;;  %v2093_v13 = vld [vmem:[#allocation5 + $0x60] sm:$0xff]   ;;  %s1611_s6 = sshll.u32 %s2898_s13, 4  ;;  %s2985_s14 = scalar_lea.hbm %s3038_s5, %s2034_s29  ;;  %s2987_s6 = int_to_ptr.vmem [resolvable:$true] %s1611_s6 }
  0x6f   : > { %1822 = vmatprep.subr.bf16.mxu0 %v2084_v4  ;;  %1910 = vmatprep.subr.bf16.mxu1 %v2528_v0  ;;  %v2091_v11 = vld [vmem:[#allocation5 + $0x18] sm:$0xff]   ;;  %v2094_v14 = vld [vmem:[#allocation5 + $0x20] sm:$0xff]   ;;  %v2096_v16 = vld [vmem:[#allocation5 + $0x68] sm:$0xff]   ;;  %s2447_s22 = scalar_lea.vmem %s2987_s6, 2688  ;;  %s2531_s23 = smov [#allocation8]  }
  0x70   : > { %v2092_v12 = vld [vmem:[#allocation5 + $0x98] sm:$0xff]   ;;  %v2095_v15 = vld [vmem:[#allocation5 + $0xa0] sm:$0xff]   ;;  %v2097_v17 = vld [vmem:[#allocation5 + $0x28] sm:$0xff]   ;;  %p2448_p11 = scmp.ne.s32.totalorder %s2987_s6, %s2447_s22  ;;  %s2451_s7 = sshll.u32 %s2531_s23, 4  ;;  %s2452_s7 = int_to_ptr.vmem [resolvable:$false] %s2451_s7 }
  0x71   : > { %v2098_v18 = vld [vmem:[#allocation5 + $0xa8] sm:$0xff]   ;;  %v2099_v19 = vld [vmem:[#allocation5 + $0x70] sm:$0xff]   ;;  %v2102_v24 = vld [vmem:[#allocation5 + $0x78] sm:$0xff]   ;;  %p2454_p5 = scmp.lt.s32.totalorder %s2987_s6, %s2452_s7 }
  0x72   : > { %1823 = vmatpush3.bf16.msra.mxu0 %v2085_v5  ;;  %1911 = vmatpush3.bf16.msra.mxu1 %v2086_v6  ;;  %v2100_v20 = vld [vmem:[#allocation5 + $0x30] sm:$0xff]   ;;  %v277_v21 = vld [vmem:[%s2740_s8 + $0x8] sm:$0xff]  ;;  %v279_v29 = vld [vmem:[%s2740_s8 + $0x18] sm:$0xff]  ;;  %p2449_p1 = pnand %p2448_p11, %p3052_p0 }
  0x73   : > { %1824 = vmatprep.subr.bf16.mxu0 %v2087_v7  ;;  %1912 = vmatprep.subr.bf16.mxu1 %v2528_v0  ;;  %v280_v22 = vld [vmem:[%s2740_s8 + $0x20] sm:$0xff]  ;;  %v2103_v26 = vld [vmem:[#allocation5 + $0x38] sm:$0xff]   ;;  %v278_v30 = vld [vmem:[%s2740_s8 + $0x10] sm:$0xff] }
  0x74   : > { %v2101_v23 = vld [vmem:[#allocation5 + $0xb0] sm:$0xff]   ;;  %v319_v25 = vpack.c.bf16 %v280_v22, %v277_v21  ;;  %v2104_v27 = vld [vmem:[#allocation5 + $0xb8] sm:$0xff]   ;;  %v2105_v44 = vld [vmem:[#allocation7] ss:$12 sps:$4 sm:$0xff]   ;;  %p2450_p3 = pneg %p2449_p1 }
  0x75   : > { %v276_v28 = vld [vmem:[%s2740_s8] sm:$0xff]  ;;  %v281_v31 = vld [vmem:[%s2740_s8 + $0x28] sm:$0xff]  ;;  %v283_v32 = vld [vmem:[%s2740_s8 + $0x38] sm:$0xff] }
  0x76   : > { %1825 = vmatpush3.bf16.msra.mxu0 %v2088_v8  ;;  %1913 = vmatpush3.bf16.msra.mxu1 %v2089_v9  ;;  %v286_v33 = vld [vmem:[%s2740_s8 + $0x50] sm:$0xff]  ;;  %v318_v34 = vpack.c.bf16 %v279_v29, %v276_v28  ;;  %v320_v35 = vpack.c.bf16 %v281_v31, %v278_v30  ;;  %v285_v38 = vld [vmem:[%s2740_s8 + $0x48] sm:$0xff]  ;;  %v284_v39 = vld [vmem:[%s2740_s8 + $0x40] sm:$0xff] }
  0x77   : > { %1826 = vmatprep.subr.bf16.mxu0 %v2090_v10  ;;  %1914 = vmatprep.subr.bf16.mxu1 %v2528_v0  ;;  %v322_v36 = vpack.c.bf16 %v286_v33, %v283_v32  ;;  %v282_v37 = vld [vmem:[%s2740_s8 + $0x30] sm:$0xff]  ;;  %v287_v40 = vld [vmem:[%s2740_s8 + $0x58] sm:$0xff]  ;;  %v289_v41 = vld [vmem:[%s2740_s8 + $0x68] sm:$0xff] }
  0x78   : > { %570 = vmatprep.mubr.bf16.mxu0 %v319_v25  ;;  %v292_v42 = vld [vmem:[%s2740_s8 + $0x80] sm:$0xff]  ;;  %v321_v43 = vpack.c.bf16 %v285_v38, %v282_v37  ;;  %v323_v45 = vpack.c.bf16 %v287_v40, %v284_v39  ;;  %v291_v50 = vld [vmem:[%s2740_s8 + $0x78] sm:$0xff]  ;;  %v290_v52 = vld [vmem:[%s2740_s8 + $0x70] sm:$0xff] }
  0x79   : > { %v325_v46 = vpack.c.bf16 %v292_v42, %v289_v41  ;;  %v2107_v47 = vld [vmem:[#allocation7 + $0x4] ss:$12 sps:$4 sm:$0xff]   ;;  %v2108_v48 = vld [vmem:[#allocation7 + $0x8] ss:$12 sps:$4 sm:$0xff]   ;;  %v2112_v56 = vld [vmem:[#allocation7 + $0x20] ss:$12 sps:$4 sm:$0xff]  }
  0x7a   : > { %1827 = vmatpush3.bf16.msra.mxu0 %v2091_v11  ;;  %1915 = vmatpush3.bf16.msra.mxu1 %v2092_v12  ;;  %v288_v49 = vld [vmem:[%s2740_s8 + $0x60] sm:$0xff]  ;;  %v2111_v51 = vld [vmem:[#allocation7 + $0x1c] ss:$12 sps:$4 sm:$0xff]   ;;  %v298_v55 = vld [vmem:[%s2740_s8 + $0xb0] sm:$0xff] }
  0x7b   : > { %1828 = vmatprep.subr.bf16.mxu0 %v2093_v13  ;;  %1916 = vmatprep.subr.bf16.mxu1 %v2528_v0  ;;  %v293_v53 = vld [vmem:[%s2740_s8 + $0x88] sm:$0xff]  ;;  %v295_v54 = vld [vmem:[%s2740_s8 + $0x98] sm:$0xff]  ;;  %v2115_v58 = vld [vmem:[#allocation7 + $0x34] ss:$12 sps:$4 sm:$0xff]   ;;  %v324_v60 = vpack.c.bf16 %v291_v50, %v288_v49  ;;  %v2530_v49 = vmov 0  }
  0x7c   : > { %v2109_v57 = vld [vmem:[#allocation7 + $0x18] ss:$12 sps:$4 sm:$0xff]   ;;  %v2113_v61 = vld [vmem:[#allocation7 + $0x30] ss:$12 sps:$4 sm:$0xff]   ;;  %v326_v62 = vpack.c.bf16 %v293_v53, %v290_v52  ;;  %v328_v63 = vpack.c.bf16 %v298_v55, %v295_v54  ;;  %v2121_v38 = vld [vmem:[#allocation7 + $0x60] ss:$12 sps:$4 sm:$0xff]  }
  0x7d   : > { %v2116_v59 = vld [vmem:[#allocation7 + $0x38] ss:$12 sps:$4 sm:$0xff]   ;;  %v2124_v39 = vld [vmem:[#allocation7 + $0x68] ss:$12 sps:$4 sm:$0xff]   ;;  %v2128_v42 = vld [vmem:[#allocation7 + $0x80] ss:$12 sps:$4 sm:$0xff]  }
  0x7e   : > { %1829 = vmatpush3.bf16.msra.mxu0 %v2094_v14  ;;  %1917 = vmatpush3.bf16.msra.mxu1 %v2095_v15  ;;  %v294_v1 = vld [vmem:[%s2740_s8 + $0x90] sm:$0xff]  ;;  %v297_v2 = vld [vmem:[%s2740_s8 + $0xa8] sm:$0xff]  ;;  %v296_v3 = vld [vmem:[%s2740_s8 + $0xa0] sm:$0xff] }
  0x7f   : > { %1830 = vmatprep.subr.bf16.mxu0 %v2096_v16  ;;  %1918 = vmatprep.subr.bf16.mxu1 %v2528_v0  ;;  %v299_v4 = vld [vmem:[%s2740_s8 + $0xb8] sm:$0xff]  ;;  %v301_v5 = vld [vmem:[%s2740_s8 + $0xc8] sm:$0xff]  ;;  %v304_v6 = vld [vmem:[%s2740_s8 + $0xe0] sm:$0xff]  ;;  %v327_v7 = vpack.c.bf16 %v297_v2, %v294_v1 }
  0x80   : > { %v329_v8 = vpack.c.bf16 %v299_v4, %v296_v3  ;;  %v331_v9 = vpack.c.bf16 %v304_v6, %v301_v5  ;;  %v300_v10 = vld [vmem:[%s2740_s8 + $0xc0] sm:$0xff]  ;;  %v303_v11 = vld [vmem:[%s2740_s8 + $0xd8] sm:$0xff]  ;;  %v302_v12 = vld [vmem:[%s2740_s8 + $0xd0] sm:$0xff] }
  0x81   : > { %v305_v13 = vld [vmem:[%s2740_s8 + $0xe8] sm:$0xff]  ;;  %v307_v14 = vld [vmem:[%s2740_s8 + $0xf8] sm:$0xff]  ;;  %v310_v15 = vld [vmem:[%s2740_s8 + $0x110] sm:$0xff]  ;;  %v330_v16 = vpack.c.bf16 %v303_v11, %v300_v10 }
  0x82   : > { %1831 = vmatpush3.bf16.msra.mxu0 %v2097_v17  ;;  %1919 = vmatpush3.bf16.msra.mxu1 %v2098_v18  ;;  %v332_v17 = vpack.c.bf16 %v305_v13, %v302_v12  ;;  %v334_v18 = vpack.c.bf16 %v310_v15, %v307_v14  ;;  %v308_v21 = vld [vmem:[%s2740_s8 + $0x100] sm:$0xff]  ;;  %v311_v22 = vld [vmem:[%s2740_s8 + $0x118] sm:$0xff]  ;;  %v314_v30 = vld [vmem:[%s2740_s8 + $0x130] sm:$0xff] }
  0x83   : > { %1832 = vmatprep.subr.bf16.mxu0 %v2099_v19  ;;  %1920 = vmatprep.subr.bf16.mxu1 %v2528_v0  ;;  %v306_v19 = vld [vmem:[%s2740_s8 + $0xf0] sm:$0xff]  ;;  %v312_v28 = vld [vmem:[%s2740_s8 + $0x120] sm:$0xff]  ;;  %v315_v29 = vld [vmem:[%s2740_s8 + $0x138] sm:$0xff] }
  0x84   : > { %v317_v31 = vld [vmem:[%s2740_s8 + $0x148] sm:$0xff]  ;;  %v336_v32 = vpack.c.bf16 %v315_v29, %v312_v28  ;;  %v2123_v37 = vld [vmem:[#allocation7 + $0x64] ss:$12 sps:$4 sm:$0xff]   ;;  %v2828_v52 = vld [vmem:[%s3035_s2] ss:$0 sm:$0xff] }
  0x85   : > { %v338_v33 = vpack.c.bf16 %v317_v31, %v314_v30  ;;  %v2127_v40 = vld [vmem:[#allocation7 + $0x7c] ss:$12 sps:$4 sm:$0xff]   ;;  %v2125_v41 = vld [vmem:[#allocation7 + $0x78] ss:$12 sps:$4 sm:$0xff]  }
  0x86   : > { %1833 = vmatpush3.bf16.msra.mxu0 %v2100_v20  ;;  %1921 = vmatpush3.bf16.msra.mxu1 %v2101_v23  ;;  %v309_v20 = vld [vmem:[%s2740_s8 + $0x108] sm:$0xff] }
  0x87   : > { %1834 = vmatprep.subr.bf16.mxu0 %v2102_v24  ;;  %1922 = vmatprep.subr.bf16.mxu1 %v2528_v0  ;;  %v313_v23 = vld [vmem:[%s2740_s8 + $0x128] sm:$0xff]  ;;  %v316_v24 = vld [vmem:[%s2740_s8 + $0x140] sm:$0xff]  ;;  %v333_v25 = vpack.c.bf16 %v309_v20, %v306_v19  ;;  %s2453_s8 = scalar_lea.vmem %s2452_s7, 5376 }
  0x88   : > { %p2455_p7 = scmp.lt.s32.totalorder %s2453_s8, %s2447_s22 }
  0x8a   : > { %1835 = vmatpush3.bf16.msra.mxu0 %v2103_v26  ;;  %1923 = vmatpush3.bf16.msra.mxu1 %v2104_v27  ;;  %v335_v26 = vpack.c.bf16 %v311_v22, %v308_v21  ;;  %v337_v27 = vpack.c.bf16 %v316_v24, %v313_v23  ;;  %p2456_p12 = por %p2455_p7, %p2454_p5 }
  0x8b   : > { %1952 = vmatprep.subr.bf16.mxu1 %v2528_v0  ;;  %984 = vmatprep.subr.bf16.mxu0 %v2107_v47  ;;  %v2133_v47 = vld [vmem:[#allocation7 + $0xa8] ss:$12 sps:$4 sm:$0xff]  }
  0x8c   : > { %p2457_p2 = pnand %p2456_p12, %p2450_p3 }
  0x8d   : > { %571 = vmatmul.mubr.bf16.vlgmr.msra.gmra.mrb[0].mxu0 %v318_v34  ;;  %1925 = vmatmul.mubr.bf16.vlgmr.msra.gmra.mrb[0].mxu1 %v320_v35  ;;  %v2119_v34 = vld [vmem:[#allocation7 + $0x4c] ss:$12 sps:$4 sm:$0xff]   ;;  %v2117_v35 = vld [vmem:[#allocation7 + $0x48] ss:$12 sps:$4 sm:$0xff]  }
  0x8e   : > { %578 = vmatprep.mubr.bf16.mxu0 %v322_v36  ;;  %1928 = vmatprep.mubr.msk.bf16.mxu1 %vm2529_vm0, %v2528_v0  ;;  %v2120_v36 = vld [vmem:[#allocation7 + $0x50] ss:$12 sps:$4 sm:$0xff]  }
  0x8f   : > { %1953 = vmatpush3.bf16.msra.mxu1 %v2108_v48  ;;  %985 = vmatpush1.bf16.msra.mxu0 %v2105_v44  ;;  %v2129_v44 = vld [vmem:[#allocation7 + $0x90] ss:$12 sps:$4 sm:$0xff]  }
  0x90   : > { %986 = vmatprep.subr.bf16.mxu0 %v2111_v51  ;;  %1954 = vmatprep.subr.bf16.mxu1 %v2528_v0  ;;  %v2136_v48 = vld [vmem:[#allocation7 + $0xb0] ss:$12 sps:$4 sm:$0xff]  }
  0x93   : > { %1955 = vmatpush3.bf16.msra.mxu1 %v2112_v56  ;;  %987 = vmatpush1.bf16.msra.mxu0 %v2109_v57 }
  0x94   : > { %1956 = vmatprep.subr.bf16.mxu1 %v2528_v0  ;;  %988 = vmatprep.subr.bf16.mxu0 %v2115_v58 }
  0x95   : > { %579 = vmatmul.mubr.bf16.gmra.mrb[4].mxu0 %v321_v43  ;;  %1929 = vmatmul.mubr.bf16.gmra.mrb[4].mxu1 %v323_v45  ;;  %v2131_v43 = vld [vmem:[#allocation7 + $0x94] ss:$12 sps:$4 sm:$0xff]   ;;  %v2132_v45 = vld [vmem:[#allocation7 + $0x98] ss:$12 sps:$4 sm:$0xff]  }
  0x96   : > { %586 = vmatprep.mubr.bf16.mxu0 %v325_v46  ;;  %1932 = vmatprep.mubr.msk.bf16.mxu1 %vm2529_vm0, %v2528_v0  ;;  %v2135_v46 = vld [vmem:[#allocation7 + $0xac] ss:$12 sps:$4 sm:$0xff]  }
  0x97   : > { %1957 = vmatpush3.bf16.msra.mxu1 %v2116_v59  ;;  %989 = vmatpush1.bf16.msra.mxu0 %v2113_v61 }
  0x98   : > { %1958 = vmatprep.subr.bf16.mxu1 %v2528_v0  ;;  %990 = vmatprep.subr.bf16.mxu0 %v2119_v34 }
  0x9b   : > { %991 = vmatpush1.bf16.msra.mxu0 %v2117_v35  ;;  %1959 = vmatpush3.bf16.msra.mxu1 %v2120_v36 }
  0x9c   : > { %1960 = vmatprep.subr.bf16.mxu1 %v2528_v0  ;;  %992 = vmatprep.subr.bf16.mxu0 %v2123_v37 }
  0x9d   : > { %587 = vmatmul.mubr.bf16.gmra.mrb[8].mxu0 %v324_v60  ;;  %1933 = vmatmul.mubr.bf16.gmra.mrb[8].mxu1 %v326_v62 }
  0x9e   : > { %594 = vmatprep.mubr.bf16.mxu0 %v328_v63  ;;  %1936 = vmatprep.mubr.msk.bf16.mxu1 %vm2529_vm0, %v2528_v0 }
  0x9f   : > { %993 = vmatpush1.bf16.msra.mxu0 %v2121_v38  ;;  %1961 = vmatpush3.bf16.msra.mxu1 %v2124_v39 }
  0xa0   : > { %1962 = vmatprep.subr.bf16.mxu1 %v2528_v0  ;;  %994 = vmatprep.subr.bf16.mxu0 %v2127_v40 }
  0xa3   : > { %995 = vmatpush1.bf16.msra.mxu0 %v2125_v41  ;;  %1963 = vmatpush3.bf16.msra.mxu1 %v2128_v42 }
  0xa4   : > { %1964 = vmatprep.subr.bf16.mxu1 %v2528_v0  ;;  %996 = vmatprep.subr.bf16.mxu0 %v2131_v43 }
  0xa5   : > { %595 = vmatmul.mubr.bf16.gmra.mrb[12].mxu0 %v327_v7  ;;  %1937 = vmatmul.mubr.bf16.gmra.mrb[12].mxu1 %v329_v8 }
  0xa6   : > { %602 = vmatprep.mubr.bf16.mxu0 %v331_v9  ;;  %1940 = vmatprep.mubr.msk.bf16.mxu1 %vm2529_vm0, %v2528_v0 }
  0xa7   : > { %997 = vmatpush1.bf16.msra.mxu0 %v2129_v44  ;;  %1965 = vmatpush3.bf16.msra.mxu1 %v2132_v45 }
  0xa8   : > { %1966 = vmatprep.subr.bf16.mxu1 %v2528_v0  ;;  %998 = vmatprep.subr.bf16.mxu0 %v2135_v46 }
  0xab   : > { %999 = vmatpush1.bf16.msra.mxu0 %v2133_v47  ;;  %1967 = vmatpush3.bf16.msra.mxu1 %v2136_v48 }
  0xad   : > { %603 = vmatmul.mubr.bf16.gmra.mrb[16].mxu0 %v330_v16  ;;  %1941 = vmatmul.mubr.bf16.gmra.mrb[16].mxu1 %v332_v17 }
  0xae   : > { %610 = vmatprep.mubr.bf16.mxu0 %v334_v18  ;;  %1944 = vmatprep.mubr.msk.bf16.mxu1 %vm2529_vm0, %v2528_v0 }
  0xb5   : > { %611 = vmatmul.mubr.bf16.gmra.mrb[20].mxu0 %v333_v25  ;;  %1945 = vmatmul.mubr.bf16.gmra.mrb[20].mxu1 %v335_v26 }
  0xb6   : > { %618 = vmatprep.mubr.bf16.mxu0 %v337_v27  ;;  %1948 = vmatprep.mubr.msk.bf16.mxu1 %vm2529_vm0, %v2528_v0 }
  0xbd   : > { %619 = vmatmul.mubr.bf16.gmra.mrb[24].mxu0 %v336_v32  ;;  %1949 = vmatmul.mubr.bf16.gmra.mrb[24].mxu1 %v338_v33 }
  0xbe   : > { %1968 = vmatprep.mubr.msk.bf16.mxu1 %vm2529_vm0, %v2528_v0  ;;  %1016 = vmatprep.mubr.bf16.mxu0 %v2530_v49 }
 0x160   : > { %v1836_v50 = vpop.f32.mrb[0].mxu0  ;;  %v661_v53 = vpop.f32.mrb[0].mxu1 }
 0x161   : > { %v1837_v51 = vpop.f32.mrb[1].mxu0  ;;  %v1926_v56 = vpop.f32.mrb[1].mxu1 }
 0x162   : > { %v1838_v54 = vadd.f32 %v1837_v51, %v1836_v50  ;;  %v1839_v55 = vpop.f32.mrb[2].mxu0  ;;  %v664_v58 = vpop.f32.mrb[2].mxu1 }
 0x163   : > { %v1840_v57 = vpop.f32.mrb[3].mxu0  ;;  %v1927_v61 = vpop.f32.mrb[3].mxu1 }
 0x164   : > { %v573_v59 = vadd.f32 %v1838_v54, %v2828_v52  ;;  %v1841_v60 = vadd.f32 %v1840_v57, %v1839_v55 }
 0x166   : > { %v662_v62 = vadd.f32 %v661_v53, %v573_v59  ;;  %v576_v63 = vadd.f32 %v1841_v60, %v2828_v52 }
 0x168   : > { %v716_v1 = vsub.f32 0.0, %v662_v62  ;;  %v665_v2 = vadd.f32 %v664_v58, %v576_v63  ;;  %v1842_v3 = vpop.f32.mrb[4].mxu0  ;;  %v669_v5 = vpop.f32.mrb[4].mxu1 }
 0x169   : > { %v1843_v4 = vpop.f32.mrb[5].mxu0  ;;  %v1930_v10 = vpop.f32.mrb[5].mxu1 }
 0x16a   : > { %v730_v6 = vmul.f32 1.442695, %v716_v1  ;;  %v717_v7 = vsub.f32 0.0, %v665_v2  ;;  %v1844_v8 = vadd.f32 %v1843_v4, %v1842_v3  ;;  %v1845_v9 = vpop.f32.mrb[6].mxu0  ;;  %v672_v12 = vpop.f32.mrb[6].mxu1 }
 0x16b   : > { %v1846_v11 = vpop.f32.mrb[7].mxu0  ;;  %v1931_v16 = vpop.f32.mrb[7].mxu1 }
 0x16c   : > { %2137 = vpow2.f32 %v730_v6  ;;  %v732_v13 = vmul.f32 1.442695, %v717_v7  ;;  %v581_v14 = vadd.f32 %v1844_v8, %v2828_v52  ;;  %v1847_v15 = vadd.f32 %v1846_v11, %v1845_v9 }
 0x16e   : > { %2139 = vpow2.f32 %v732_v13  ;;  %v670_v17 = vadd.f32 %v669_v5, %v581_v14  ;;  %v584_v18 = vadd.f32 %v1847_v15, %v2828_v52 }
 0x170   : > { %v718_v19 = vsub.f32 0.0, %v670_v17  ;;  %v673_v20 = vadd.f32 %v672_v12, %v584_v18  ;;  %v1848_v21 = vpop.f32.mrb[8].mxu0  ;;  %v677_v23 = vpop.f32.mrb[8].mxu1 }
 0x171   : > { %v1849_v22 = vpop.f32.mrb[9].mxu0  ;;  %v1934_v28 = vpop.f32.mrb[9].mxu1 }
 0x172   : > { %v734_v24 = vmul.f32 1.442695, %v718_v19  ;;  %v719_v25 = vsub.f32 0.0, %v673_v20  ;;  %v1850_v26 = vadd.f32 %v1849_v22, %v1848_v21  ;;  %v1851_v27 = vpop.f32.mrb[10].mxu0  ;;  %v680_v30 = vpop.f32.mrb[10].mxu1 }
 0x173   : > { %v1852_v29 = vpop.f32.mrb[11].mxu0  ;;  %v1935_v34 = vpop.f32.mrb[11].mxu1 }
 0x174   : > { %2141 = vpow2.f32 %v734_v24  ;;  %v736_v31 = vmul.f32 1.442695, %v719_v25  ;;  %v589_v32 = vadd.f32 %v1850_v26, %v2828_v52  ;;  %v1853_v33 = vadd.f32 %v1852_v29, %v1851_v27 }
 0x176   : > { %v2138_v35 = vpop.eup %2137  ;;  %2143 = vpow2.f32 %v736_v31  ;;  %v678_v36 = vadd.f32 %v677_v23, %v589_v32  ;;  %v592_v37 = vadd.f32 %v1853_v33, %v2828_v52 }
 0x177   : > { %v758_v38 = vadd.f32 1.0, %v2138_v35 }
 0x178   : > { %v2140_v39 = vpop.eup %2139  ;;  %v720_v40 = vsub.f32 0.0, %v678_v36  ;;  %v681_v41 = vadd.f32 %v680_v30, %v592_v37  ;;  %v1854_v42 = vpop.f32.mrb[12].mxu0 }
 0x179   : > { %v759_v43 = vadd.f32 1.0, %v2140_v39  ;;  %v1855_v44 = vpop.f32.mrb[13].mxu0  ;;  %v685_v45 = vpop.f32.mrb[12].mxu1  ;;  %2145 = vrcp.f32 %v758_v38 }
 0x17a   : > { %v738_v46 = vmul.f32 1.442695, %v720_v40  ;;  %v721_v47 = vsub.f32 0.0, %v681_v41  ;;  %v1856_v48 = vadd.f32 %v1855_v44, %v1854_v42  ;;  %v1857_v50 = vpop.f32.mrb[14].mxu0  ;;  %v1938_v51 = vpop.f32.mrb[13].mxu1 }
 0x17b   : > { %2147 = vrcp.f32 %v759_v43  ;;  %v1858_v53 = vpop.f32.mrb[15].mxu0  ;;  %v688_v54 = vpop.f32.mrb[14].mxu1 }
 0x17c   : > { %2149 = vpow2.f32 %v738_v46  ;;  %v740_v55 = vmul.f32 1.442695, %v721_v47  ;;  %v597_v56 = vadd.f32 %v1856_v48, %v2828_v52  ;;  %v1859_v57 = vadd.f32 %v1858_v53, %v1857_v50  ;;  %v1939_v58 = vpop.f32.mrb[15].mxu1 }
 0x17e   : > { %v2142_v59 = vpop.eup %2141  ;;  %2151 = vpow2.f32 %v740_v55  ;;  %v686_v60 = vadd.f32 %v685_v45, %v597_v56  ;;  %v600_v61 = vadd.f32 %v1859_v57, %v2828_v52 }
 0x17f   : > { %v760_v62 = vadd.f32 1.0, %v2142_v59 }
 0x180   : > { %v2144_v63 = vpop.eup %2143  ;;  %v722_v1 = vsub.f32 0.0, %v686_v60  ;;  %v689_v2 = vadd.f32 %v688_v54, %v600_v61  ;;  %v1860_v3 = vpop.f32.mrb[16].mxu0 }
 0x181   : > { %v761_v4 = vadd.f32 1.0, %v2144_v63  ;;  %v1861_v5 = vpop.f32.mrb[17].mxu0  ;;  %v693_v6 = vpop.f32.mrb[16].mxu1  ;;  %2153 = vrcp.f32 %v760_v62 }
 0x182   : > { %v742_v7 = vmul.f32 1.442695, %v722_v1  ;;  %v723_v8 = vsub.f32 0.0, %v689_v2  ;;  %v1862_v9 = vadd.f32 %v1861_v5, %v1860_v3  ;;  %v1863_v10 = vpop.f32.mrb[18].mxu0  ;;  %v1942_v11 = vpop.f32.mrb[17].mxu1 }
 0x183   : > { %2155 = vrcp.f32 %v761_v4  ;;  %v1864_v12 = vpop.f32.mrb[19].mxu0  ;;  %v696_v13 = vpop.f32.mrb[18].mxu1 }
 0x184   : > { %v2146_v14 = vpop.eup %2145  ;;  %2157 = vpow2.f32 %v742_v7  ;;  %v744_v15 = vmul.f32 1.442695, %v723_v8  ;;  %v605_v16 = vadd.f32 %v1862_v9, %v2828_v52  ;;  %v1865_v17 = vadd.f32 %v1864_v12, %v1863_v10  ;;  %v1943_v18 = vpop.f32.mrb[19].mxu1 }
 0x185   : > { %v2148_v19 = vpop.eup %2147 }
 0x186   : > { %v2150_v20 = vpop.eup %2149  ;;  %2159 = vpow2.f32 %v744_v15  ;;  %v694_v21 = vadd.f32 %v693_v6, %v605_v16  ;;  %v608_v22 = vadd.f32 %v1865_v17, %v2828_v52  ;;  %v800_v23 = vpack.c.bf16 %v2148_v19, %v2146_v14 }
 0x187   : > { %v762_v24 = vadd.f32 1.0, %v2150_v20 }
 0x188   : > { %v2152_v25 = vpop.eup %2151  ;;  %v724_v26 = vsub.f32 0.0, %v694_v21  ;;  %v697_v27 = vadd.f32 %v696_v13, %v608_v22  ;;  %v1866_v28 = vpop.f32.mrb[20].mxu0  ;;  %1017 = vmatmul.mubr.bf16.vlgmr.msra.gmra.mrb[28].mxu0 %v800_v23  ;;  %1969 = vmatmul.mubr.bf16.vlgmr.msra.gmra.mrb[28].mxu1 %v800_v23 }
 0x189   : > { %v763_v29 = vadd.f32 1.0, %v2152_v25  ;;  %v1867_v30 = vpop.f32.mrb[21].mxu0  ;;  %v701_v31 = vpop.f32.mrb[20].mxu1  ;;  %1026 = vmatprep.mubr.bf16.mxu0 %v2530_v49  ;;  %1972 = vmatprep.mubr.msk.bf16.mxu1 %vm2529_vm0, %v2528_v0  ;;  %2161 = vrcp.f32 %v762_v24 }
 0x18a   : > { %v746_v32 = vmul.f32 1.442695, %v724_v26  ;;  %v725_v33 = vsub.f32 0.0, %v697_v27  ;;  %v1868_v34 = vadd.f32 %v1867_v30, %v1866_v28  ;;  %v1869_v35 = vpop.f32.mrb[22].mxu0  ;;  %v1946_v36 = vpop.f32.mrb[21].mxu1 }
 0x18b   : > { %2163 = vrcp.f32 %v763_v29  ;;  %v1870_v37 = vpop.f32.mrb[23].mxu0  ;;  %v704_v38 = vpop.f32.mrb[22].mxu1 }
 0x18c   : > { %v2154_v39 = vpop.eup %2153  ;;  %2165 = vpow2.f32 %v746_v32  ;;  %v748_v40 = vmul.f32 1.442695, %v725_v33  ;;  %v613_v41 = vadd.f32 %v1868_v34, %v2828_v52  ;;  %v1871_v42 = vadd.f32 %v1870_v37, %v1869_v35  ;;  %v1947_v43 = vpop.f32.mrb[23].mxu1 }
 0x18d   : > { %v2156_v44 = vpop.eup %2155 }
 0x18e   : > { %v2158_v45 = vpop.eup %2157  ;;  %2167 = vpow2.f32 %v748_v40  ;;  %v702_v46 = vadd.f32 %v701_v31, %v613_v41  ;;  %v616_v47 = vadd.f32 %v1871_v42, %v2828_v52  ;;  %v801_v48 = vpack.c.bf16 %v2156_v44, %v2154_v39  ;;  %v839_v44 = vld [vmem:[%s3037_s4] sm:$0x7] }
 0x18f   : > { %v764_v50 = vadd.f32 1.0, %v2158_v45  ;;  %v841_v40 = vlaneseq }
 0x190   : > { %v2160_v51 = vpop.eup %2159  ;;  %v726_v53 = vsub.f32 0.0, %v702_v46  ;;  %v705_v54 = vadd.f32 %v704_v38, %v616_v47  ;;  %v1872_v55 = vpop.f32.mrb[24].mxu0  ;;  %1027 = vmatmul.mubr.bf16.gmra.mrb[32].mxu0 %v801_v48  ;;  %1973 = vmatmul.mubr.bf16.gmra.mrb[32].mxu1 %v801_v48 }
 0x191   : > { %v765_v56 = vadd.f32 1.0, %v2160_v51  ;;  %v1873_v57 = vpop.f32.mrb[25].mxu0  ;;  %v709_v58 = vpop.f32.mrb[24].mxu1  ;;  %1036 = vmatprep.mubr.bf16.mxu0 %v2530_v49  ;;  %1976 = vmatprep.mubr.msk.bf16.mxu1 %vm2529_vm0, %v2528_v0  ;;  %2169 = vrcp.f32 %v764_v50  ;;  %v842_v41 = vshrl.u32 %v841_v40, 7 }
 0x192   : > { %v750_v59 = vmul.f32 1.442695, %v726_v53  ;;  %v727_v60 = vsub.f32 0.0, %v705_v54  ;;  %v1874_v61 = vadd.f32 %v1873_v57, %v1872_v55  ;;  %v1875_v62 = vpop.f32.mrb[26].mxu0  ;;  %v1950_v63 = vpop.f32.mrb[25].mxu1 }
 0x193   : > { %2171 = vrcp.f32 %v765_v56  ;;  %v1876_v1 = vpop.f32.mrb[27].mxu0  ;;  %v712_v2 = vpop.f32.mrb[26].mxu1  ;;  %v843_v42 = vsub.s32 0, %v842_v41  ;;  %v851_v43 = vsub.s32 2, %v842_v41  ;;  %v847_v45 = vsub.s32 1, %v842_v41 }
 0x194   : > { %v2162_v3 = vpop.eup %2161  ;;  %2173 = vpow2.f32 %v750_v59  ;;  %v752_v4 = vmul.f32 1.442695, %v727_v60  ;;  %v621_v5 = vadd.f32 %v1874_v61, %v2828_v52  ;;  %v1877_v6 = vadd.f32 %v1876_v1, %v1875_v62  ;;  %v1951_v7 = vpop.f32.mrb[27].mxu1 }
 0x195   : > { %v2164_v8 = vpop.eup %2163  ;;  %v2865_v46 = vrot.slane %v839_v44, %v843_v42  ;;  %v2869_v47 = vrot.slane %v839_v44, %v847_v45 }
 0x196   : > { %v2166_v9 = vpop.eup %2165  ;;  %2175 = vpow2.f32 %v752_v4  ;;  %v710_v10 = vadd.f32 %v709_v58, %v621_v5  ;;  %v624_v11 = vadd.f32 %v1877_v6, %v2828_v52  ;;  %v802_v12 = vpack.c.bf16 %v2164_v8, %v2162_v3 }
 0x197   : > { %v766_v13 = vadd.f32 1.0, %v2166_v9 }
 0x198   : > { %v2168_v14 = vpop.eup %2167  ;;  %v728_v15 = vsub.f32 0.0, %v710_v10  ;;  %v713_v16 = vadd.f32 %v712_v2, %v624_v11  ;;  %1037 = vmatmul.mubr.bf16.gmra.mrb[36].mxu0 %v802_v12  ;;  %1977 = vmatmul.mubr.bf16.gmra.mrb[36].mxu1 %v802_v12 }
 0x199   : > { %v767_v17 = vadd.f32 1.0, %v2168_v14  ;;  %1046 = vmatprep.mubr.bf16.mxu0 %v2530_v49  ;;  %1980 = vmatprep.mubr.msk.bf16.mxu1 %vm2529_vm0, %v2528_v0  ;;  %2177 = vrcp.f32 %v766_v13 }
 0x19a   : > { %v754_v18 = vmul.f32 1.442695, %v728_v15  ;;  %v729_v19 = vsub.f32 0.0, %v713_v16 }
 0x19b   : > { %2179 = vrcp.f32 %v767_v17  ;;  %v2170_v20 = vpop.eup %2169 }
 0x19c   : > { %2181 = vpow2.f32 %v754_v18  ;;  %v756_v52 = vmul.f32 1.442695, %v729_v19 }
 0x19d   : > { %v2172_v21 = vpop.eup %2171 }
 0x19e   : > { %v2174_v22 = vpop.eup %2173  ;;  %2183 = vpow2.f32 %v756_v52  ;;  %v803_v23 = vpack.c.bf16 %v2172_v21, %v2170_v20 }
 0x19f   : > { %v768_v24 = vadd.f32 1.0, %v2174_v22 }
 0x1a0   : > { %v2176_v25 = vpop.eup %2175  ;;  %1047 = vmatmul.mubr.bf16.gmra.mrb[40].mxu0 %v803_v23  ;;  %1981 = vmatmul.mubr.bf16.gmra.mrb[40].mxu1 %v803_v23 }
 0x1a1   : > { %v769_v26 = vadd.f32 1.0, %v2176_v25  ;;  %1056 = vmatprep.mubr.bf16.mxu0 %v2530_v49  ;;  %1984 = vmatprep.mubr.msk.bf16.mxu1 %vm2529_vm0, %v2528_v0  ;;  %2185 = vrcp.f32 %v768_v24 }
 0x1a3   : > { %2187 = vrcp.f32 %v769_v26  ;;  %v2178_v27 = vpop.eup %2177 }
 0x1a5   : > { %v2180_v28 = vpop.eup %2179 }
 0x1a6   : > { %v2182_v29 = vpop.eup %2181  ;;  %v804_v30 = vpack.c.bf16 %v2180_v28, %v2178_v27 }
 0x1a7   : > { %v770_v31 = vadd.f32 1.0, %v2182_v29 }
 0x1a8   : > { %v2184_v32 = vpop.eup %2183  ;;  %1057 = vmatmul.mubr.bf16.gmra.mrb[44].mxu0 %v804_v30  ;;  %1985 = vmatmul.mubr.bf16.gmra.mrb[44].mxu1 %v804_v30 }
 0x1a9   : > { %v771_v33 = vadd.f32 1.0, %v2184_v32  ;;  %1066 = vmatprep.mubr.bf16.mxu0 %v2530_v49  ;;  %1988 = vmatprep.mubr.msk.bf16.mxu1 %vm2529_vm0, %v2528_v0  ;;  %2189 = vrcp.f32 %v770_v31 }
 0x1ab   : > { %2191 = vrcp.f32 %v771_v33  ;;  %v2186_v34 = vpop.eup %2185 }
 0x1ad   : > { %v2188_v35 = vpop.eup %2187 }
 0x1ae   : > { %v805_v36 = vpack.c.bf16 %v2188_v35, %v2186_v34 }
 0x1b0   : > { %1067 = vmatmul.mubr.bf16.gmra.mrb[48].mxu0 %v805_v36  ;;  %1989 = vmatmul.mubr.bf16.gmra.mrb[48].mxu1 %v805_v36 }
 0x1b1   : > { %1076 = vmatprep.mubr.bf16.mxu0 %v2530_v49  ;;  %1992 = vmatprep.mubr.msk.bf16.mxu1 %vm2529_vm0, %v2528_v0  ;;  %v2867_v49 = vrot.slane %v839_v44, %v851_v43 }
 0x1b3   : > { %v2190_v37 = vpop.eup %2189 }
 0x1b5   : > { %v2192_v38 = vpop.eup %2191 }
 0x1b6   : > { %v806_v39 = vpack.c.bf16 %v2192_v38, %v2190_v37 }
 0x1b8   : > { %1077 = vmatmul.mubr.bf16.gmra.mrb[52].mxu0 %v806_v39  ;;  %1993 = vmatmul.mubr.bf16.gmra.mrb[52].mxu1 %v806_v39 }
 0x25b   : > { %v1018_v0 = vpop.f32.mrb[28].mxu0  ;;  %v1121_v48 = vpop.f32.mrb[28].mxu1 }
 0x25c   : > { %v1019_v50 = vadd.f32 %v1018_v0, %v2865_v46  ;;  %v1122_v51 = vadd.f32 %v1121_v48, %v2867_v49  ;;  %v1020_v53 = vpop.f32.mrb[29].mxu0  ;;  %v1970_v54 = vpop.f32.mrb[29].mxu1 }
 0x25d   : > { %v1021_v55 = vadd.f32 %v1020_v53, %v2869_v47  ;;  %v1022_v56 = vpop.f32.mrb[30].mxu0  ;;  %v1124_v57 = vpop.f32.mrb[30].mxu1 }
 0x25e   : > { %v1176_v58 = vsub.f32 0.0, %v1019_v50  ;;  %v1178_v59 = vsub.f32 0.0, %v1122_v51  ;;  %v1023_v60 = vadd.f32 %v1022_v56, %v2865_v46  ;;  %v1125_v61 = vadd.f32 %v1124_v57, %v2867_v49  ;;  %v1024_v62 = vpop.f32.mrb[31].mxu0  ;;  %v1971_v63 = vpop.f32.mrb[31].mxu1 }
 0x25f   : > { %v1177_v1 = vsub.f32 0.0, %v1021_v55  ;;  %v1025_v2 = vadd.f32 %v1024_v62, %v2869_v47 }
 0x260   : > { %v1218_v3 = vmul.f32 1.442695, %v1176_v58  ;;  %v1222_v4 = vmul.f32 1.442695, %v1178_v59  ;;  %v1179_v5 = vsub.f32 0.0, %v1023_v60  ;;  %v1181_v6 = vsub.f32 0.0, %v1125_v61 }
 0x261   : > { %v1220_v7 = vmul.f32 1.442695, %v1177_v1  ;;  %v1180_v8 = vsub.f32 0.0, %v1025_v2 }
 0x262   : > { %2193 = vpow2.f32 %v1218_v3  ;;  %v1224_v9 = vmul.f32 1.442695, %v1179_v5  ;;  %v1228_v10 = vmul.f32 1.442695, %v1181_v6 }
 0x263   : > { %2195 = vpow2.f32 %v1222_v4  ;;  %v1226_v11 = vmul.f32 1.442695, %v1180_v8  ;;  %v1028_v12 = vpop.f32.mrb[32].mxu0  ;;  %v1129_v13 = vpop.f32.mrb[32].mxu1 }
 0x264   : > { %2197 = vpow2.f32 %v1220_v7  ;;  %v1029_v14 = vadd.f32 %v1028_v12, %v2865_v46  ;;  %v1130_v15 = vadd.f32 %v1129_v13, %v2867_v49  ;;  %v1030_v16 = vpop.f32.mrb[33].mxu0  ;;  %v1974_v17 = vpop.f32.mrb[33].mxu1 }
 0x265   : > { %2199 = vpow2.f32 %v1224_v9  ;;  %v1031_v18 = vadd.f32 %v1030_v16, %v2869_v47  ;;  %v1032_v19 = vpop.f32.mrb[34].mxu0  ;;  %v1132_v20 = vpop.f32.mrb[34].mxu1 }
 0x266   : > { %2201 = vpow2.f32 %v1228_v10  ;;  %v1182_v52 = vsub.f32 0.0, %v1029_v14  ;;  %v1184_v21 = vsub.f32 0.0, %v1130_v15  ;;  %v1033_v22 = vadd.f32 %v1032_v19, %v2865_v46  ;;  %v1034_v23 = vpop.f32.mrb[35].mxu0  ;;  %v1975_v24 = vpop.f32.mrb[35].mxu1 }
 0x267   : > { %2203 = vpow2.f32 %v1226_v11  ;;  %v1183_v25 = vsub.f32 0.0, %v1031_v18  ;;  %v1133_v26 = vadd.f32 %v1132_v20, %v2867_v49  ;;  %v1035_v32 = vadd.f32 %v1034_v23, %v2869_v47 }
 0x268   : > { %v1230_v27 = vmul.f32 1.442695, %v1182_v52  ;;  %v1234_v28 = vmul.f32 1.442695, %v1184_v21  ;;  %v1185_v29 = vsub.f32 0.0, %v1033_v22 }
 0x269   : > { %v1232_v30 = vmul.f32 1.442695, %v1183_v25  ;;  %v1187_v31 = vsub.f32 0.0, %v1133_v26  ;;  %v1186_v43 = vsub.f32 0.0, %v1035_v32 }
 0x26a   : > { %2205 = vpow2.f32 %v1230_v27  ;;  %v1236_v33 = vmul.f32 1.442695, %v1185_v29 }
 0x26b   : > { %2207 = vpow2.f32 %v1234_v28  ;;  %v1240_v34 = vmul.f32 1.442695, %v1187_v31  ;;  %v1038_v35 = vpop.f32.mrb[36].mxu0  ;;  %v1137_v36 = vpop.f32.mrb[36].mxu1  ;;  %v1238_v62 = vmul.f32 1.442695, %v1186_v43 }
 0x26c   : > { %v2194_v37 = vpop.eup %2193  ;;  %2209 = vpow2.f32 %v1232_v30  ;;  %v1039_v38 = vadd.f32 %v1038_v35, %v2865_v46  ;;  %v1040_v39 = vpop.f32.mrb[37].mxu0  ;;  %v1138_v56 = vadd.f32 %v1137_v36, %v2867_v49 }
 0x26d   : > { %v1978_v40 = vpop.f32.mrb[37].mxu1  ;;  %v2196_v41 = vpop.eup %2195  ;;  %v1302_v42 = vadd.f32 1.0, %v2194_v37  ;;  %2211 = vpow2.f32 %v1236_v33  ;;  %v1041_v59 = vadd.f32 %v1040_v39, %v2869_v47 }
 0x26e   : > { %v1042_v44 = vpop.f32.mrb[38].mxu0  ;;  %v1140_v45 = vpop.f32.mrb[38].mxu1  ;;  %v1304_v48 = vadd.f32 1.0, %v2196_v41  ;;  %2213 = vpow2.f32 %v1240_v34  ;;  %v1188_v50 = vsub.f32 0.0, %v1039_v38  ;;  %v1190_v4 = vsub.f32 0.0, %v1138_v56 }
 0x26f   : > { %v2198_v0 = vpop.eup %2197  ;;  %v1044_v51 = vpop.f32.mrb[39].mxu0  ;;  %2215 = vrcp.f32 %v1302_v42  ;;  %v1043_v63 = vadd.f32 %v1042_v44, %v2865_v46  ;;  %v1141_v3 = vadd.f32 %v1140_v45, %v2867_v49  ;;  %v1189_v9 = vsub.f32 0.0, %v1041_v59 }
 0x270   : > { %v1979_v53 = vpop.f32.mrb[39].mxu1  ;;  %v2200_v54 = vpop.eup %2199  ;;  %v1303_v55 = vadd.f32 1.0, %v2198_v0  ;;  %2217 = vrcp.f32 %v1304_v48  ;;  %v1242_v2 = vmul.f32 1.442695, %v1188_v50  ;;  %v1045_v5 = vadd.f32 %v1044_v51, %v2869_v47 }
 0x271   : > { %v2202_v57 = vpop.eup %2201  ;;  %v1305_v58 = vadd.f32 1.0, %v2200_v54  ;;  %v1191_v19 = vsub.f32 0.0, %v1043_v63  ;;  %v1193_v20 = vsub.f32 0.0, %v1141_v3  ;;  %v1246_v23 = vmul.f32 1.442695, %v1190_v4 }
 0x272   : > { %v2204_v60 = vpop.eup %2203  ;;  %2219 = vrcp.f32 %v1303_v55  ;;  %v1307_v61 = vadd.f32 1.0, %v2202_v57  ;;  %v1192_v24 = vsub.f32 0.0, %v1045_v5  ;;  %v1244_v28 = vmul.f32 1.442695, %v1189_v9 }
 0x273   : > { %2221 = vrcp.f32 %v1305_v58  ;;  %v1306_v1 = vadd.f32 1.0, %v2204_v60  ;;  %v1048_v6 = vpop.f32.mrb[40].mxu0  ;;  %v1145_v7 = vpop.f32.mrb[40].mxu1  ;;  %v1248_v35 = vmul.f32 1.442695, %v1191_v19 }
 0x274   : > { %2223 = vrcp.f32 %v1307_v61  ;;  %v2206_v8 = vpop.eup %2205  ;;  %v1050_v10 = vpop.f32.mrb[41].mxu0  ;;  %v1049_v14 = vadd.f32 %v1048_v6, %v2865_v46  ;;  %v1146_v29 = vadd.f32 %v1145_v7, %v2867_v49  ;;  %v1252_v36 = vmul.f32 1.442695, %v1193_v20 }
 0x275   : > { %2225 = vrcp.f32 %v1306_v1  ;;  %v1982_v11 = vpop.f32.mrb[41].mxu1  ;;  %v2208_v12 = vpop.eup %2207  ;;  %v1308_v13 = vadd.f32 1.0, %v2206_v8  ;;  %v1051_v33 = vadd.f32 %v1050_v10, %v2869_v47  ;;  %v1250_v40 = vmul.f32 1.442695, %v1192_v24 }
 0x276   : > { %2227 = vpow2.f32 %v1238_v62  ;;  %v1052_v15 = vpop.f32.mrb[42].mxu0  ;;  %v1148_v16 = vpop.f32.mrb[42].mxu1  ;;  %v1310_v18 = vadd.f32 1.0, %v2208_v12  ;;  %v1194_v32 = vsub.f32 0.0, %v1049_v14  ;;  %v1196_v0 = vsub.f32 0.0, %v1146_v29 }
 0x277   : > { %v2210_v17 = vpop.eup %2209  ;;  %2229 = vpow2.f32 %v1242_v2  ;;  %v1054_v52 = vpop.f32.mrb[43].mxu0  ;;  %v1053_v37 = vadd.f32 %v1052_v15, %v2865_v46  ;;  %v1149_v41 = vadd.f32 %v1148_v16, %v2867_v49  ;;  %v1195_v55 = vsub.f32 0.0, %v1051_v33 }
 0x278   : > { %v2212_v21 = vpop.eup %2211  ;;  %2231 = vrcp.f32 %v1308_v13  ;;  %v1309_v22 = vadd.f32 1.0, %v2210_v17  ;;  %v1983_v25 = vpop.f32.mrb[43].mxu1  ;;  %v1055_v48 = vadd.f32 %v1054_v52, %v2869_v47  ;;  %v1254_v54 = vmul.f32 1.442695, %v1194_v32 }
 0x279   : > { %v2214_v26 = vpop.eup %2213  ;;  %2233 = vrcp.f32 %v1310_v18  ;;  %v1311_v27 = vadd.f32 1.0, %v2212_v21  ;;  %v1197_v60 = vsub.f32 0.0, %v1053_v37  ;;  %v1199_v2 = vsub.f32 0.0, %v1149_v41 }
 0x27a   : > { %v2216_v30 = vpop.eup %2215  ;;  %2235 = vrcp.f32 %v1309_v22  ;;  %v1313_v31 = vadd.f32 1.0, %v2214_v26  ;;  %v1258_v5 = vmul.f32 1.442695, %v1196_v0  ;;  %v1198_v6 = vsub.f32 0.0, %v1055_v48 }
 0x27b   : > { %v2218_v34 = vpop.eup %2217  ;;  %2237 = vrcp.f32 %v1311_v27  ;;  %v1058_v42 = vpop.f32.mrb[44].mxu0  ;;  %v1256_v9 = vmul.f32 1.442695, %v1195_v55  ;;  %v1260_v11 = vmul.f32 1.442695, %v1197_v60 }
 0x27c   : > { %v2220_v38 = vpop.eup %2219  ;;  %v1793_v39 = vpack.c.bf16 %v2218_v34, %v2218_v34  ;;  %2239 = vrcp.f32 %v1313_v31  ;;  %v1153_v43 = vpop.f32.mrb[44].mxu1  ;;  %v1059_v12 = vadd.f32 %v1058_v42, %v2865_v46  ;;  %v1264_v15 = vmul.f32 1.442695, %v1199_v2 }
 0x27d   : > { %v2222_v44 = vpop.eup %2221  ;;  %v1792_v45 = vpack.c.bf16 %v2220_v38, %v2216_v30  ;;  %2241 = vpow2.f32 %v1246_v23  ;;  %v1060_v50 = vpop.f32.mrb[45].mxu0  ;;  %v1154_v16 = vadd.f32 %v1153_v43, %v2867_v49  ;;  %v1262_v52 = vmul.f32 1.442695, %v1198_v6 }
 0x27e   : > { %v1986_v51 = vpop.f32.mrb[45].mxu1  ;;  %v2224_v53 = vpop.eup %2223  ;;  %1569 = vst [vmem:[%s2898_s13 + $0x8] sm:$0xf] %v1793_v39  ;;  %2243 = vpow2.f32 %v1244_v28  ;;  %v1061_v24 = vadd.f32 %v1060_v50, %v2869_v47  ;;  %v1200_v29 = vsub.f32 0.0, %v1059_v12 }
 0x27f   : > { %v1062_v56 = vpop.f32.mrb[46].mxu0  ;;  %v1156_v57 = vpop.f32.mrb[46].mxu1  ;;  %1568 = vst [vmem:[%s2898_s13] sm:$0xff] %v1792_v45  ;;  %v1795_v59 = vpack.c.bf16 %v2224_v53, %v2224_v53  ;;  %2245 = vpow2.f32 %v1248_v35  ;;  %v1202_v34 = vsub.f32 0.0, %v1154_v16 }
 0x280   : > { %v2226_v58 = vpop.eup %2225  ;;  %v2902_v61 = vpop.f32.mrb[47].mxu0  ;;  %2247 = vpow2.f32 %v1252_v36  ;;  %v1063_v35 = vadd.f32 %v1062_v56, %v2865_v46  ;;  %v1157_v38 = vadd.f32 %v1156_v57, %v2867_v49  ;;  %v1201_v41 = vsub.f32 0.0, %v1061_v24 }
 0x281   : > { %v1987_v62 = vpop.f32.mrb[47].mxu1  ;;  %v2228_v63 = vpop.eup %2227  ;;  %v1794_v1 = vpack.c.bf16 %v2226_v58, %v2222_v44  ;;  %1571 = vst [vmem:[%s2898_s13 + $0x14] sm:$0xf] %v1795_v59  ;;  %2249 = vpow2.f32 %v1250_v40  ;;  %v1266_v44 = vmul.f32 1.442695, %v1200_v29  ;;  %v1065_v57 = vadd.f32 %v2902_v61, %v2869_v47 }
 0x282   : > { %v2230_v3 = vpop.eup %2229  ;;  %v1312_v4 = vadd.f32 1.0, %v2228_v63  ;;  %2251 = vpow2.f32 %v1254_v54  ;;  %v1270_v48 = vmul.f32 1.442695, %v1202_v34  ;;  %v1203_v50 = vsub.f32 0.0, %v1063_v35 }
 0x283   : > { %v2232_v7 = vpop.eup %2231  ;;  %1570 = vst [vmem:[%s2898_s13 + $0xc] sm:$0xff] %v1794_v1  ;;  %v1314_v8 = vadd.f32 1.0, %v2230_v3  ;;  %v1068_v17 = vpop.f32.mrb[48].mxu0  ;;  %v1205_v56 = vsub.f32 0.0, %v1157_v38  ;;  %v1268_v63 = vmul.f32 1.442695, %v1201_v41 }
 0x284   : > { %v2234_v10 = vpop.eup %2233  ;;  %2253 = vrcp.f32 %v1312_v4  ;;  %v1161_v18 = vpop.f32.mrb[48].mxu1  ;;  %v1069_v1 = vadd.f32 %v1068_v17, %v2865_v46  ;;  %v1204_v16 = vsub.f32 0.0, %v1065_v57 }
 0x285   : > { %v2236_v13 = vpop.eup %2235  ;;  %v1797_v14 = vpack.c.bf16 %v2234_v10, %v2234_v10  ;;  %2255 = vrcp.f32 %v1314_v8  ;;  %v2910_v21 = vpop.f32.mrb[49].mxu0 }
 0x286   : > { %v2908_v19 = vpop.eup %2237  ;;  %v1796_v20 = vpack.c.bf16 %v2236_v13, %v2232_v7  ;;  %2257 = vpow2.f32 %v1258_v5  ;;  %v1990_v22 = vpop.f32.mrb[49].mxu1  ;;  %v1162_v5 = vadd.f32 %v1161_v18, %v2867_v49  ;;  %v1071_v24 = vadd.f32 %v2910_v21, %v2869_v47 }
 0x287   : > { %v2240_v23 = vpop.eup %2239  ;;  %1573 = vst [vmem:[%s2898_s13 + $0x20] sm:$0xf] %v1797_v14  ;;  %2259 = vpow2.f32 %v1256_v9  ;;  %v2914_v25 = vpop.f32.mrb[50].mxu0 }
 0x288   : > { %v2916_v26 = vpop.f32.mrb[50].mxu1  ;;  %v2242_v27 = vpop.eup %2241  ;;  %1572 = vst [vmem:[%s2898_s13 + $0x18] sm:$0xff] %v1796_v20  ;;  %v1799_v28 = vpack.c.bf16 %v2240_v23, %v2240_v23  ;;  %2261 = vpow2.f32 %v1260_v11  ;;  %v1272_v11 = vmul.f32 1.442695, %v1203_v50  ;;  %v1208_v23 = vsub.f32 0.0, %v1162_v5 }
 0x289   : > { %v2919_v30 = vpop.f32.mrb[51].mxu0  ;;  %v1991_v31 = vpop.f32.mrb[51].mxu1  ;;  %v1316_v33 = vadd.f32 1.0, %v2242_v27  ;;  %2263 = vpow2.f32 %v1264_v15  ;;  %v1276_v15 = vmul.f32 1.442695, %v1205_v56  ;;  %v1073_v29 = vadd.f32 %v2914_v25, %v2865_v46 }
 0x28a   : > { %v2244_v32 = vpop.eup %2243  ;;  %1575 = vst [vmem:[%s2898_s13 + $0x2c] sm:$0xf] %v1799_v28  ;;  %2265 = vpow2.f32 %v1262_v52  ;;  %v1165_v31 = vadd.f32 %v2916_v26, %v2867_v49  ;;  %v1207_v38 = vsub.f32 0.0, %v1071_v24 }
 0x28b   : > { %v2246_v36 = vpop.eup %2245  ;;  %v1315_v37 = vadd.f32 1.0, %v2244_v32  ;;  %2267 = vrcp.f32 %v1316_v33  ;;  %v1078_v51 = vpop.f32.mrb[52].mxu0  ;;  %v1209_v41 = vsub.f32 0.0, %v1073_v29 }
 0x28c   : > { %v2248_v39 = vpop.eup %2247  ;;  %v1317_v40 = vadd.f32 1.0, %v2246_v36  ;;  %v1169_v53 = vpop.f32.mrb[52].mxu1  ;;  %v2930_v6 = vadd.f32 %v1078_v51, %v2865_v46 }
 0x28d   : > { %v2250_v42 = vpop.eup %2249  ;;  %2269 = vrcp.f32 %v1315_v37  ;;  %v1319_v43 = vadd.f32 1.0, %v2248_v39  ;;  %v1080_v58 = vpop.f32.mrb[53].mxu0  ;;  %v2933_v61 = vadd.f32 %v1169_v53, %v2867_v49  ;;  %v1274_v37 = vmul.f32 1.442695, %v1204_v16 }
 0x28e   : > { %v2252_v45 = vpop.eup %2251  ;;  %2271 = vrcp.f32 %v1317_v40  ;;  %v1318_v0 = vadd.f32 1.0, %v2250_v42  ;;  %v1994_v59 = vpop.f32.mrb[53].mxu1  ;;  %v2937_v12 = vadd.f32 %v1080_v58, %v2869_v47  ;;  %v1282_v40 = vmul.f32 1.442695, %v1208_v23 }
 0x28f   : > { %v2254_v54 = vpop.eup %2253  ;;  %2273 = vrcp.f32 %v1319_v43  ;;  %v1320_v55 = vadd.f32 1.0, %v2252_v45  ;;  %v1082_v2 = vpop.f32.mrb[54].mxu0  ;;  %v1212_v50 = vsub.f32 0.0, %v2930_v6 }
 0x290   : > { %v2256_v60 = vpop.eup %2255  ;;  %v1798_v62 = vpack.c.bf16 %v2254_v54, %v2908_v19  ;;  %2275 = vrcp.f32 %v1318_v0  ;;  %v1172_v3 = vpop.f32.mrb[54].mxu1  ;;  %v1206_v19 = vsub.f32 0.0, %v1069_v1  ;;  %v2940_v20 = vadd.f32 %v1082_v2, %v2865_v46 }
 0x291   : > { %v2258_v4 = vpop.eup %2257  ;;  %2277 = vrcp.f32 %v1320_v55  ;;  %v1084_v7 = vpop.f32.mrb[55].mxu0  ;;  %v2949_v34 = vadd.f32 %v1172_v3, %v2867_v49  ;;  %v1075_v46 = vadd.f32 %v2919_v30, %v2869_v47  ;;  %v1284_v54 = vmul.f32 1.442695, %v1209_v41 }
 0x292   : > { %v1995_v8 = vpop.f32.mrb[55].mxu1  ;;  %v2260_v9 = vpop.eup %2259  ;;  %1574 = vst [vmem:[%s2898_s13 + $0x24] sm:$0xff] %v1798_v62  ;;  %v1322_v10 = vadd.f32 1.0, %v2258_v4  ;;  %2279 = vpow2.f32 %v1266_v44  ;;  %v2952_v35 = vadd.f32 %v1084_v7, %v2869_v47  ;;  %v1278_v26 = vmul.f32 1.442695, %v1206_v19 }
 0x293   : > { %v2262_v13 = vpop.eup %2261  ;;  %v1321_v14 = vadd.f32 1.0, %v2260_v9  ;;  %2281 = vpow2.f32 %v1270_v48  ;;  %v1211_v44 = vsub.f32 0.0, %v1165_v31  ;;  %v1210_v47 = vsub.f32 0.0, %v1075_v46 }
 0x294   : > { %v2264_v17 = vpop.eup %2263  ;;  %2283 = vrcp.f32 %v1322_v10  ;;  %v1323_v18 = vadd.f32 1.0, %v2262_v13  ;;  %v1280_v48 = vmul.f32 1.442695, %v1207_v38  ;;  %v1214_v7 = vsub.f32 0.0, %v2933_v61 }
 0x295   : > { %v2266_v52 = vpop.eup %2265  ;;  %2285 = vrcp.f32 %v1321_v14  ;;  %v1325_v22 = vadd.f32 1.0, %v2264_v17  ;;  %v1288_v57 = vmul.f32 1.442695, %v1211_v44  ;;  %v1213_v10 = vsub.f32 0.0, %v2937_v12 }
 0x296   : > { %v2268_v27 = vpop.eup %2267  ;;  %2287 = vrcp.f32 %v1323_v18  ;;  %v1324_v28 = vadd.f32 1.0, %v2266_v52  ;;  %v1294_v18 = vmul.f32 1.442695, %v1214_v7  ;;  %v1215_v12 = vsub.f32 0.0, %v2940_v20 }
 0x297   : > { %v2270_v32 = vpop.eup %2269  ;;  %v1801_v33 = vpack.c.bf16 %v2268_v27, %v2268_v27  ;;  %2289 = vrcp.f32 %v1325_v22  ;;  %v1292_v52 = vmul.f32 1.442695, %v1213_v10  ;;  %v1217_v29 = vsub.f32 0.0, %v2949_v34 }
 0x298   : > { %v2272_v21 = vpop.eup %2271  ;;  %v1800_v36 = vpack.c.bf16 %v2270_v32, %v2256_v60  ;;  %2291 = vrcp.f32 %v1324_v28  ;;  %v1286_v60 = vmul.f32 1.442695, %v1210_v47 }
 0x299   : > { %v2274_v25 = vpop.eup %2273  ;;  %1577 = vst [vmem:[%s2898_s13 + $0x38] sm:$0xf] %v1801_v33  ;;  %2293 = vpow2.f32 %v1268_v63  ;;  %v1290_v63 = vmul.f32 1.442695, %v1212_v50  ;;  %v1216_v33 = vsub.f32 0.0, %v2952_v35 }
 0x29a   : > { %v2276_v39 = vpop.eup %2275  ;;  %1576 = vst [vmem:[%s2898_s13 + $0x30] sm:$0xff] %v1800_v36  ;;  %v1803_v49 = vpack.c.bf16 %v2274_v25, %v2274_v25  ;;  %2295 = vpow2.f32 %v1272_v11  ;;  %v1296_v25 = vmul.f32 1.442695, %v1215_v12 }
 0x29b   : > { %v2278_v42 = vpop.eup %2277  ;;  %v1802_v43 = vpack.c.bf16 %v2276_v39, %v2272_v21  ;;  %2297 = vpow2.f32 %v1276_v15  ;;  %v1298_v39 = vmul.f32 1.442695, %v1216_v33 }
 0x29c   : > { %v2280_v45 = vpop.eup %2279  ;;  %1579 = vst [vmem:[%s2898_s13 + $0x44] sm:$0xf] %v1803_v49  ;;  %2299 = vpow2.f32 %v1274_v37 }
 0x29d   : > { %v2282_v30 = vpop.eup %2281  ;;  %1578 = vst [vmem:[%s2898_s13 + $0x3c] sm:$0xff] %v1802_v43  ;;  %v1326_v0 = vadd.f32 1.0, %v2280_v45  ;;  %2301 = vpow2.f32 %v1278_v26  ;;  %v1300_v26 = vmul.f32 1.442695, %v1217_v29 }
 0x29e   : > { %v2284_v51 = vpop.eup %2283  ;;  %v1328_v53 = vadd.f32 1.0, %v2282_v30  ;;  %2303 = vpow2.f32 %v1282_v40 }
 0x29f   : > { %v2286_v55 = vpop.eup %2285  ;;  %v1805_v56 = vpack.c.bf16 %v2284_v51, %v2284_v51  ;;  %2305 = vrcp.f32 %v1326_v0 }
 0x2a0   : > { %v2288_v58 = vpop.eup %2287  ;;  %v1804_v59 = vpack.c.bf16 %v2286_v55, %v2278_v42  ;;  %2307 = vrcp.f32 %v1328_v53 }
 0x2a1   : > { %v2290_v62 = vpop.eup %2289  ;;  %1581 = vst [vmem:[%s2898_s13 + $0x50] sm:$0xf] %v1805_v56  ;;  %2309 = vpow2.f32 %v1280_v48 }
 0x2a2   : > { %v2292_v1 = vpop.eup %2291  ;;  %1580 = vst [vmem:[%s2898_s13 + $0x48] sm:$0xff] %v1804_v59  ;;  %v1807_v2 = vpack.c.bf16 %v2290_v62, %v2290_v62  ;;  %2311 = vpow2.f32 %v1284_v54 }
 0x2a3   : > { %v2294_v3 = vpop.eup %2293  ;;  %v1806_v4 = vpack.c.bf16 %v2292_v1, %v2288_v58  ;;  %2313 = vpow2.f32 %v1288_v57 }
 0x2a4   : > { %v2296_v5 = vpop.eup %2295  ;;  %1583 = vst [vmem:[%s2898_s13 + $0x5c] sm:$0xf] %v1807_v2  ;;  %v1327_v6 = vadd.f32 1.0, %v2294_v3  ;;  %2315 = vpow2.f32 %v1286_v60 }
 0x2a5   : > { %v2298_v8 = vpop.eup %2297  ;;  %1582 = vst [vmem:[%s2898_s13 + $0x54] sm:$0xff] %v1806_v4  ;;  %v1329_v9 = vadd.f32 1.0, %v2296_v5  ;;  %2317 = vpow2.f32 %v1290_v63 }
 0x2a6   : > { %v2300_v11 = vpop.eup %2299  ;;  %2319 = vrcp.f32 %v1327_v6  ;;  %v1331_v13 = vadd.f32 1.0, %v2298_v8 }
 0x2a7   : > { %v2302_v14 = vpop.eup %2301  ;;  %2321 = vrcp.f32 %v1329_v9  ;;  %v1330_v15 = vadd.f32 1.0, %v2300_v11 }
 0x2a8   : > { %v2304_v16 = vpop.eup %2303  ;;  %2323 = vrcp.f32 %v1331_v13  ;;  %v1332_v17 = vadd.f32 1.0, %v2302_v14 }
 0x2a9   : > { %v2306_v19 = vpop.eup %2305  ;;  %2325 = vrcp.f32 %v1330_v15  ;;  %v1334_v61 = vadd.f32 1.0, %v2304_v16 }
 0x2aa   : > { %v2308_v22 = vpop.eup %2307  ;;  %2327 = vrcp.f32 %v1332_v17 }
 0x2ab   : > { %v2310_v23 = vpop.eup %2309  ;;  %v1809_v24 = vpack.c.bf16 %v2308_v22, %v2308_v22  ;;  %2329 = vrcp.f32 %v1334_v61 }
 0x2ac   : > { %v2312_v27 = vpop.eup %2311  ;;  %v1333_v28 = vadd.f32 1.0, %v2310_v23  ;;  %2331 = vpow2.f32 %v1294_v18 }
 0x2ad   : > { %v2314_v31 = vpop.eup %2313  ;;  %1585 = vst [vmem:[%s2898_s13 + $0x68] sm:$0xf] %v1809_v24  ;;  %v1335_v32 = vadd.f32 1.0, %v2312_v27  ;;  %2333 = vpow2.f32 %v1292_v52 }
 0x2ae   : > { %v2316_v21 = vpop.eup %2315  ;;  %2335 = vrcp.f32 %v1333_v28  ;;  %v1337_v36 = vadd.f32 1.0, %v2314_v31 }
 0x2af   : > { %v2318_v37 = vpop.eup %2317  ;;  %2337 = vrcp.f32 %v1335_v32  ;;  %v1336_v46 = vadd.f32 1.0, %v2316_v21 }
 0x2b0   : > { %v2320_v20 = vpop.eup %2319  ;;  %2339 = vrcp.f32 %v1337_v36  ;;  %v1338_v43 = vadd.f32 1.0, %v2318_v37 }
 0x2b1   : > { %v2322_v38 = vpop.eup %2321  ;;  %v1808_v34 = vpack.c.bf16 %v2320_v20, %v2306_v19  ;;  %2341 = vrcp.f32 %v1336_v46 }
 0x2b2   : > { %v2324_v49 = vpop.eup %2323  ;;  %2343 = vpow2.f32 %v1296_v25 }
 0x2b3   : > { %v2326_v40 = vpop.eup %2325  ;;  %1584 = vst [vmem:[%s2898_s13 + $0x60] sm:$0xff] %v1808_v34  ;;  %v1811_v35 = vpack.c.bf16 %v2324_v49, %v2324_v49  ;;  %2345 = vpow2.f32 %v1300_v26 }
 0x2b4   : > { %v2328_v41 = vpop.eup %2327  ;;  %v1810_v42 = vpack.c.bf16 %v2326_v40, %v2322_v38  ;;  %2347 = vpow2.f32 %v1298_v39 }
 0x2b5   : > { %v2330_v44 = vpop.eup %2329  ;;  %1587 = vst [vmem:[%s2898_s13 + $0x74] sm:$0xf] %v1811_v35  ;;  %2349 = vrcp.f32 %v1338_v43 }
 0x2b6   : > { %v2332_v45 = vpop.eup %2331  ;;  %1586 = vst [vmem:[%s2898_s13 + $0x6c] sm:$0xff] %v1810_v42  ;;  %v1813_v47 = vpack.c.bf16 %v2330_v44, %v2330_v44 }
 0x2b7   : > { %v2334_v30 = vpop.eup %2333  ;;  %v1340_v0 = vadd.f32 1.0, %v2332_v45 }
 0x2b8   : > { %v2336_v48 = vpop.eup %2335  ;;  %1589 = vst [vmem:[%s2898_s13 + $0x80] sm:$0xf] %v1813_v47  ;;  %v1339_v50 = vadd.f32 1.0, %v2334_v30 }
 0x2b9   : > { %v2338_v51 = vpop.eup %2337  ;;  %v1812_v53 = vpack.c.bf16 %v2336_v48, %v2328_v41  ;;  %2351 = vrcp.f32 %v1340_v0 }
 0x2ba   : > { %v2340_v54 = vpop.eup %2339  ;;  %2353 = vrcp.f32 %v1339_v50 }
 0x2bb   : > { %v2342_v55 = vpop.eup %2341  ;;  %1588 = vst [vmem:[%s2898_s13 + $0x78] sm:$0xff] %v1812_v53  ;;  %v1815_v56 = vpack.c.bf16 %v2340_v54, %v2340_v54 }
 0x2bc   : > { %v1814_v57 = vpack.c.bf16 %v2342_v55, %v2338_v51  ;;  %v2344_v58 = vpop.eup %2343 }
 0x2bd   : > { %1591 = vst [vmem:[%s2898_s13 + $0x8c] sm:$0xf] %v1815_v56  ;;  %v2346_v59 = vpop.eup %2345  ;;  %v1341_v60 = vadd.f32 1.0, %v2344_v58 }
 0x2be   : > { %1590 = vst [vmem:[%s2898_s13 + $0x84] sm:$0xff] %v1814_v57  ;;  %v2348_v62 = vpop.eup %2347  ;;  %v1343_v63 = vadd.f32 1.0, %v2346_v59 }
 0x2bf   : > { %2355 = vrcp.f32 %v1341_v60  ;;  %v1342_v1 = vadd.f32 1.0, %v2348_v62  ;;  %v2350_v2 = vpop.eup %2349 }
 0x2c0   : > { %2357 = vrcp.f32 %v1343_v63 }
 0x2c1   : > { %2359 = vrcp.f32 %v1342_v1 }
 0x2c3   : > { %v2352_v3 = vpop.eup %2351 }
 0x2c4   : > { %v2354_v4 = vpop.eup %2353  ;;  %v1817_v5 = vpack.c.bf16 %v2352_v3, %v2352_v3 }
 0x2c5   : > { %v1816_v6 = vpack.c.bf16 %v2354_v4, %v2350_v2 }
 0x2c6   : > { %1593 = vst [vmem:[%s2898_s13 + $0x98] sm:$0xf] %v1817_v5 }
 0x2c7   : > { %1592 = vst [vmem:[%s2898_s13 + $0x90] sm:$0xff] %v1816_v6 }
 0x2c9   : > { %v2356_v7 = vpop.eup %2355 }
 0x2ca   : > { %v2358_v8 = vpop.eup %2357 }
 0x2cb   : > { %v2360_v9 = vpop.eup %2359  ;;  %v1819_v10 = vpack.c.bf16 %v2358_v8, %v2358_v8 }
 0x2cc   : > { %v1818_v11 = vpack.c.bf16 %v2360_v9, %v2356_v7 }
 0x2cd   : > { %1595 = vst [vmem:[%s2898_s13 + $0xa4] sm:$0xf] %v1819_v10 }
 0x2ce   : > { %1594 = vst [vmem:[%s2898_s13 + $0x9c] sm:$0xff] %v1818_v11 }
 0x2cf   : > { %2460 = shalt.err (!%p2457_p2)
}
 0x2d0   : > { %s2461_s24 = scalar_lea.hbm %s2985_s14, 2688  ;;  %s2465_s11 = scalar_lea.hbm %s3038_s5, 5376 }
 0x2d1   : > { %p2462_p13 = scmp.ne.s32.totalorder %s2985_s14, %s2461_s24  ;;  %p2466_p4 = scmp.lt.u32.totalorder %s2985_s14, %s3038_s5 }
 0x2d2   : > { %p2467_p9 = scmp.lt.u32.totalorder %s2465_s11, %s2461_s24  ;;  %p2469_p11 = scmp.lt.u32.totalorder %s2461_s24, %s2985_s14 }
 0x2d3   : > { %p2463_p6 = pnand %p2462_p13, %p3052_p0 }
 0x2d4   : > { %p2468_p8 = por %p2467_p9, %p2466_p4 }
 0x2d5   : > { %p2464_p10 = pneg %p2463_p6 }
 0x2d6   : > { %p2470_p1 = por %p2469_p11, %p2468_p8 }
 0x2d8   : > { %p2471_p3 = pnand %p2470_p1, %p2464_p10 }
 0x2da   : > { %2474 = shalt.err (!%p2471_p3)
}
 0x2db   : > { %s2532_s29 = smov 192   ;;  %s2533_s9 = smov 12  }
 0x2dc   : > { %2011 = dma.vmem_to_hbm [thread:$0]  (%p3052_p0), %s2987_s6, 2688, %s2985_s14, %s1597_s15, %s2532_s29, %s2532_s29, %s2533_s9  }
 0x2dd PF: > { %s1626_s28 = sand.u32 1, %s2505_s18   ;;  %p3053_p5 = scmp.ne.s32.totalorder %s3043_s25, 0 }
 0x2de   : > { %p3054_p7 = scmp.ge.s32.totalorder %s2517_s21, 2  ;;  %s1627_s22 = scalar_lea.sflag [#allocation4], %s1626_s28 }
 0x2e0   : > { %p2025_p12 = pnand %p3054_p7, %p3053_p5 }
 0x2e2   : > { %2500 = dma.done.wait (!%p2025_p12), %s1627_s22, 2688  }
 0x2e3   : > { %2502 = vsyncadd (!%p2025_p12), %s1627_s22, 4294964608  ;;  %p19_p2 = scmp.ge.s32.totalorder %s2674_s16, 4   ;;  %s3055_s18 = smov %s2509_s19 }
 0x2e4   : > { %s3056_s19 = smov %s2513_s20  ;;  %s3057_s20 = smov %s2684_s27 }
 0x2e5   : > { %s3058_s21 = smov %s2674_s16  ;;  %21 = sbr.rel (!%p19_p2) target bundleno = 6 (0x6), region = 93 }
 0x2ec   :  { %1632 = vsyncpa [#allocation3], 1 }
 0x2ed   :  { %1634 = vsyncpa [#allocation3 + $0x1], 1 }
 0x2ee   :  { %1635 = vsyncpa [#allocation6], 1 }
 0x2ef   :  { %1636 = vsyncpa [#allocation4], 1 }
 0x2f0   :  { %1638 = vsyncpa [#allocation4 + $0x1], 1 }

</bundles_post_ra>
